<compile_context>
chip_gen: v6e
topology: v6e:2x2x1
jax: 0.10.0
libtpu: 0.0.40
codegen_flags: <defaults>
</compile_context>

<pallas_src>
import functools

import jax
import jax.numpy as jnp
from jax import lax
from jax.experimental import pallas as pl
from jax.experimental.pallas import tpu as pltpu

# ----------------------------- problem sizes --------------------------------
D = 4            # input_size (number of series)
N = 8            # n_dim (per-series hidden width)
H = D * N        # flat marginal hidden size == joint hidden size (32)
H2 = 2 * H
H3 = 3 * H
B = 2            # batch size


# ----------------------------- fused Pallas kernel ---------------------------
def _cogruode_kernel(dt,
                     # scalar prefetch (SMEM)
                     nsteps_ref, lflag_ref,
                     # dense per-time-step observation planes
                     xcat_ref, mobs_ref, obsrow_ref,
                     # marginal GRU-ODE (block-diag, gate-fused)
                     m_urz_c_ref, m_uh_c_ref, m_brz_c_ref, m_bh_c_ref,
                     # joint GRU-ODE (gate-fused)
                     j_urz_o_ref, j_uh_o_ref, j_brz_o_ref, j_bh_o_ref,
                     # marginal Bayes update
                     m_win_d_ref, m_urz_d_ref, m_uh_d_ref, m_brz_d_ref, m_bh_d_ref,
                     # joint Bayes update
                     j_wrzh_ref, j_urz_ref, j_uh_ref, j_brz_ref, j_bh_ref,
                     # mask expansion (D -> H)
                     e_exp_ref,
                     # p_model
                     pw1_m_ref, pw1_j_ref, pb1_ref, pw2_ref, pb2_ref,
                     # loss accumulators (resident outputs)
                     mse_ref, mae_ref, mape_ref, msum_ref,
                     # VMEM scratch carrying the states across grid steps
                     mgn_scr, joint_scr):
    j = pl.program_id(0)

    @pl.when(j == 0)
    def _():
        mgn_scr[...] = jnp.zeros_like(mgn_scr)
        joint_scr[...] = jnp.zeros_like(joint_scr)
        mse_ref[...] = jnp.zeros_like(mse_ref)
        mae_ref[...] = jnp.zeros_like(mae_ref)
        mape_ref[...] = jnp.zeros_like(mape_ref)
        msum_ref[...] = jnp.zeros_like(msum_ref)

    # ---- explicit-Euler ODE propagation over this inter-event interval -----
    m_urz_c = m_urz_c_ref[...]; m_uh_c = m_uh_c_ref[...]
    m_brz_c = m_brz_c_ref[...]; m_bh_c = m_bh_c_ref[...]
    j_urz_o = j_urz_o_ref[...]; j_uh_o = j_uh_o_ref[...]
    j_brz_o = j_brz_o_ref[...]; j_bh_o = j_bh_o_ref[...]

    def euler_step(_, carry):
        h, jh = carry
        # marginal per-series GRU-ODE (block-diagonal == einsum('bij,ijk->bik'))
        rz = jax.nn.sigmoid(
            jnp.dot(h, m_urz_c, preferred_element_type=jnp.float32) + m_brz_c)
        r, z = rz[:, :H], rz[:, H:]
        h_t = jnp.tanh(
            jnp.dot(r * h, m_uh_c, preferred_element_type=jnp.float32) + m_bh_c)
        h = h + dt * (1.0 - z) * (h_t - h)
        # joint GRU-ODE
        jrz = jax.nn.sigmoid(
            jnp.dot(jh, j_urz_o, preferred_element_type=jnp.float32) + j_brz_o)
        jr, jz = jrz[:, :H], jrz[:, H:]
        jh_t = jnp.tanh(
            jnp.dot(jh * jr, j_uh_o, preferred_element_type=jnp.float32) + j_bh_o)
        jh = jh + dt * (1.0 - jz) * (jh_t - jh)
        return h, jh

    mgn_h, joint_h = lax.fori_loop(0, nsteps_ref[j], euler_step,
                                   (mgn_scr[...], joint_scr[...]))

    # ---- p_model on the pre-update hidden states + masked loss -------------
    # TODO(synk): training-mode nn.Dropout RNG masking is not implemented
    # (inference-mode identity, matching model.eval()).
    act = jnp.maximum(
        jnp.dot(mgn_h, pw1_m_ref[...], preferred_element_type=jnp.float32)
        + jnp.dot(joint_h, pw1_j_ref[...], preferred_element_type=jnp.float32)
        + pb1_ref[...], 0.0)
    p = jnp.dot(act, pw2_ref[...], preferred_element_type=jnp.float32) + pb2_ref[...]

    xcat = xcat_ref[0]           # (B, 2D)  [:, :D] channel-0 values, [:, D:] channel-1
    md = mobs_ref[0]             # (B, D)   channel mask M
    obs = obsrow_ref[0]          # (B, 1)   row-was-observed flag

    flag = lflag_ref[j].astype(jnp.float32)     # loss only when current_time > 0
    x_tgt = xcat[:, 1:D]                        # (B, D-1) targets (series 1..D-1)
    mm = md[:, 1:] * obs                        # (B, D-1) combined mask
    diff = x_tgt - p
    mse_ref[...] += flag * jnp.sum(diff * diff * mm, axis=(0, 1), keepdims=True)
    mae_ref[...] += flag * jnp.sum(jnp.abs(diff) * mm, axis=(0, 1), keepdims=True)
    mape_ref[...] += flag * jnp.sum(jnp.abs(diff) / (x_tgt + 1e-8) * mm,
                                    axis=(0, 1), keepdims=True)
    msum_ref[...] += flag * jnp.sum(mm, axis=(0, 1), keepdims=True)

    # ---- Bayes update: marginal (per-series GRU, block-diagonalized) -------
    xin = jnp.dot(xcat, m_win_d_ref[...], preferred_element_type=jnp.float32)   # (B, 3H)
    rz = jax.nn.sigmoid(
        xin[:, :H2]
        + jnp.dot(mgn_h, m_urz_d_ref[...], preferred_element_type=jnp.float32)
        + m_brz_d_ref[...])
    r, z = rz[:, :H], rz[:, H:]
    h_t = jnp.tanh(
        xin[:, H2:]
        + jnp.dot(r * mgn_h, m_uh_d_ref[...], preferred_element_type=jnp.float32)
        + m_bh_d_ref[...])
    hn = z * mgn_h + (1.0 - z) * h_t
    mexp = jnp.dot(md, e_exp_ref[...], preferred_element_type=jnp.float32)       # (B, H)
    hn = mgn_h * (1.0 - mexp) + hn * mexp          # per-channel observation mask
    new_mgn = mgn_h + obs * (hn - mgn_h)           # only observed rows change

    # ---- Bayes update: joint (driven by the *updated* marginal hidden) -----
    wx = jnp.dot(new_mgn, j_wrzh_ref[...], preferred_element_type=jnp.float32)   # (B, 3H)
    jrz = jax.nn.sigmoid(
        wx[:, :H2]
        + jnp.dot(joint_h, j_urz_ref[...], preferred_element_type=jnp.float32)
        + j_brz_ref[...])
    jr, jz = jrz[:, :H], jrz[:, H:]
    jh_t = jnp.tanh(
        wx[:, H2:]
        + jnp.dot(joint_h * jr, j_uh_ref[...], preferred_element_type=jnp.float32)
        + j_bh_ref[...])
    jn = jh_t + jz * (joint_h - jh_t)
    new_joint = joint_h + obs * (jn - joint_h)

    mgn_scr[...] = new_mgn
    joint_scr[...] = new_joint


# ----------------------------- call wrapper ----------------------------------
WEIGHT_KEYS = [
    "m_urz_c", "m_uh_c", "m_brz_c", "m_bh_c",
    "j_urz_o", "j_uh_o", "j_brz_o", "j_bh_o",
    "m_win_d", "m_urz_d", "m_uh_d", "m_brz_d", "m_bh_d",
    "j_wrzh", "j_urz", "j_uh", "j_brz", "j_bh",
    "e_exp",
    "pw1_m", "pw1_j", "pb1", "pw2", "pb2",
]


def _const_map(ndim):
    def imap(j, nsteps, lflag):
        return (0,) * ndim
    return imap


def _dense_map(j, nsteps, lflag):
    return (j, 0, 0)


@functools.partial(jax.jit, static_argnames=("dt",))
def cogruode_forward(packed, Xcat, Mf, OBS, nsteps, lflag, dt):
    T = Xcat.shape[0]
    weights = [packed[k] for k in WEIGHT_KEYS]

    in_specs = ([pl.BlockSpec((1, B, 2 * D), _dense_map),
                 pl.BlockSpec((1, B, D), _dense_map),
                 pl.BlockSpec((1, B, 1), _dense_map)]
                + [pl.BlockSpec(w.shape, _const_map(w.ndim)) for w in weights])
    out_specs = tuple(pl.BlockSpec((1, 1), _const_map(2)) for _ in range(4))
    out_shape = tuple(jax.ShapeDtypeStruct((1, 1), jnp.float32) for _ in range(4))

    grid_spec = pltpu.PrefetchScalarGridSpec(
        num_scalar_prefetch=2,
        grid=(T,),
        in_specs=in_specs,
        out_specs=out_specs,
        scratch_shapes=[pltpu.VMEM((B, H), jnp.float32),
                        pltpu.VMEM((B, H), jnp.float32)])

    mse, mae, mape, msum = pl.pallas_call(
        functools.partial(_cogruode_kernel, float(dt)),
        grid_spec=grid_spec,
        out_shape=out_shape,
        compiler_params=pltpu.CompilerParams(dimension_semantics=("arbitrary",)),
    )(nsteps, lflag, Xcat, Mf, OBS, *weights)

    denom = jnp.where(msum[0, 0] > 0, msum[0, 0], jnp.float32(1.0))  # guard /0
    return mse[0, 0] / denom, mae[0, 0] / denom, mape[0, 0] / denom


# ----------------------------- host-side glue --------------------------------
def build_schedule(obs_times, event_pt, X, M, batch_idx, dt):
    """Scatter the event stream into dense per-time planes and compute the
    per-interval Euler step counts (same float accumulation as the reference)."""
    T = len(obs_times)
    X = jnp.asarray(X, jnp.float32)
    M = jnp.asarray(M, jnp.float32)
    batch_idx = jnp.asarray(batch_idx, jnp.int32)

    Xcat = jnp.zeros((T, B, 2 * D), jnp.float32)
    Mf = jnp.zeros((T, B, D), jnp.float32)
    OBS = jnp.zeros((T, B, 1), jnp.float32)
    nsteps, lflag = [], []
    current_time = 0.0
    for j, t in enumerate(obs_times):
        s = 0
        while current_time < t:
            current_time += dt
            s += 1
        nsteps.append(s)
        lflag.append(1 if current_time > 0 else 0)
        start, end = int(event_pt[j]), int(event_pt[j + 1])
        i_obs = batch_idx[start:end]
        Xcat = Xcat.at[j, i_obs, :D].set(X[start:end, :, 0])
        Xcat = Xcat.at[j, i_obs, D:].set(X[start:end, :, 1])
        Mf = Mf.at[j, i_obs].set(M[start:end])
        OBS = OBS.at[j, i_obs, 0].set(1.0)
    return (Xcat, Mf, OBS,
            jnp.array(nsteps, jnp.int32), jnp.array(lflag, jnp.int32))


# ----------------------------- parameter init / packing ----------------------
def xavier_uniform(key, shape, gain=1.0):
    fan_in, fan_out = shape[-2], shape[-1]
    a = gain * jnp.sqrt(6.0 / (fan_in + fan_out))
    return jax.random.uniform(key, shape, jnp.float32, -a, a)


def orthogonal(key, shape):
    if len(shape) == 2:
        return jax.nn.initializers.orthogonal()(key, shape, jnp.float32)
    keys = jax.random.split(key, shape[0])
    return jnp.stack([jax.nn.initializers.orthogonal()(k, shape[1:], jnp.float32)
                      for k in keys])


def init_params(key):
    ks = jax.random.split(key, 24)
    zeros = lambda s: jnp.zeros(s, jnp.float32)
    p = {
        # mgn_GRUODE
        "U_r_c": orthogonal(ks[0], (D, N, N)),
        "U_z_c": orthogonal(ks[1], (D, N, N)),
        "U_h_c": orthogonal(ks[2], (D, N, N)),
        "b_r_c": zeros((D, N)), "b_z_c": zeros((D, N)), "b_h_c": zeros((D, N)),
    }
    # mgn_GRU (Bayes update): torch W_*_d shape (D, 2, N) -> two input planes
    Wr = xavier_uniform(ks[3], (D, 2, N))
    Wz = xavier_uniform(ks[4], (D, 2, N))
    Wh = xavier_uniform(ks[5], (D, 2, N))
    p.update({
        "W_r0": Wr[:, 0, :], "W_r1": Wr[:, 1, :],
        "W_z0": Wz[:, 0, :], "W_z1": Wz[:, 1, :],
        "W_h0": Wh[:, 0, :], "W_h1": Wh[:, 1, :],
        "U_r_d": orthogonal(ks[6], (D, N, N)),
        "U_z_d": orthogonal(ks[7], (D, N, N)),
        "U_h_d": orthogonal(ks[8], (D, N, N)),
        "b_r_d": zeros((D, N)), "b_z_d": zeros((D, N)), "b_h_d": zeros((D, N)),
    })
    # joint_GRU (Bayes update)
    p.update({
        "jW_r": xavier_uniform(ks[9], (H, H)),
        "jW_z": xavier_uniform(ks[10], (H, H)),
        "jW_h": xavier_uniform(ks[11], (H, H)),
        "jU_r": orthogonal(ks[12], (H, H)),
        "jU_z": orthogonal(ks[13], (H, H)),
        "jU_h": orthogonal(ks[14], (H, H)),
        "jb_r": zeros((1, H)), "jb_z": zeros((1, H)), "jb_h": zeros((1, H)),
    })
    # joint_GRUODE
    p.update({
        "jU_r_o": orthogonal(ks[15], (H, H)),
        "jU_z_o": orthogonal(ks[16], (H, H)),
        "jU_h_o": orthogonal(ks[17], (H, H)),
        "jb_r_o": zeros((1, H)), "jb_z_o": zeros((1, H)), "jb_h_o": zeros((1, H)),
    })
    # p_model (weights stored (in, out) == torch weight transposed)
    g = float(jnp.sqrt(2.0))
    p.update({
        "pW1": xavier_uniform(ks[18], (2 * H, 2 * H), gain=g), "pb1": zeros((1, 2 * H)),
        "pW2": xavier_uniform(ks[19], (2 * H, D - 1), gain=g), "pb2": zeros((1, D - 1)),
    })
    return p


def _block_diag(U):           # (D, N, N) -> (H, H)
    out = jnp.zeros((H, H), jnp.float32)
    for d in range(D):
        out = out.at[d * N:(d + 1) * N, d * N:(d + 1) * N].set(U[d])
    return out


def _expand_rows(W):          # (D, N) -> (D, H) with W[d] at cols d*N:(d+1)*N
    out = jnp.zeros((D, H), jnp.float32)
    for d in range(D):
        out = out.at[d, d * N:(d + 1) * N].set(W[d])
    return out


def pack_params(p):
    """Block-diagonalize the per-series GRUs and fuse gate weights (host-side)."""
    q = {
        # marginal GRU-ODE
        "m_urz_c": jnp.concatenate([_block_diag(p["U_r_c"]),
                                    _block_diag(p["U_z_c"])], axis=1),
        "m_uh_c": _block_diag(p["U_h_c"]),
        "m_brz_c": jnp.concatenate([p["b_r_c"].reshape(1, H),
                                    p["b_z_c"].reshape(1, H)], axis=1),
        "m_bh_c": p["b_h_c"].reshape(1, H),
        # joint GRU-ODE
        "j_urz_o": jnp.concatenate([p["jU_r_o"], p["jU_z_o"]], axis=1),
        "j_uh_o": p["jU_h_o"],
        "j_brz_o": jnp.concatenate([p["jb_r_o"], p["jb_z_o"]], axis=1),
        "j_bh_o": p["jb_h_o"],
        # marginal Bayes update
        "m_urz_d": jnp.concatenate([_block_diag(p["U_r_d"]),
                                    _block_diag(p["U_z_d"])], axis=1),
        "m_uh_d": _block_diag(p["U_h_d"]),
        "m_brz_d": jnp.concatenate([p["b_r_d"].reshape(1, H),
                                    p["b_z_d"].reshape(1, H)], axis=1),
        "m_bh_d": p["b_h_d"].reshape(1, H),
        # joint Bayes update
        "j_wrzh": jnp.concatenate([p["jW_r"], p["jW_z"], p["jW_h"]], axis=1),
        "j_urz": jnp.concatenate([p["jU_r"], p["jU_z"]], axis=1),
        "j_uh": p["jU_h"],
        "j_brz": jnp.concatenate([p["jb_r"], p["jb_z"]], axis=1),
        "j_bh": p["jb_h"],
        # channel-mask expansion (D -> H)
        "e_exp": _expand_rows(jnp.ones((D, N), jnp.float32)),
        # p_model (first layer split to avoid an in-kernel concat)
        "pw1_m": p["pW1"][:H], "pw1_j": p["pW1"][H:],
        "pb1": p["pb1"], "pw2": p["pW2"], "pb2": p["pb2"],
    }
    # observation-input weights for all three gates, both channels: (2D, 3H)
    w0 = jnp.concatenate([_expand_rows(p["W_r0"]), _expand_rows(p["W_z0"]),
                          _expand_rows(p["W_h0"])], axis=1)
    w1 = jnp.concatenate([_expand_rows(p["W_r1"]), _expand_rows(p["W_z1"]),
                          _expand_rows(p["W_h1"])], axis=1)
    q["m_win_d"] = jnp.concatenate([w0, w1], axis=0)
    return q


# ----------------------------- main ------------------------------------------
if __name__ == "__main__":
    key = jax.random.PRNGKey(0)
    k_par, k_x = jax.random.split(key)
    packed = pack_params(init_params(k_par))

    # synthetic event stream: 3 observation times, 5 events total
    obs_times = [0.0, 0.3, 0.6]
    event_pt = [0, 2, 3, 5]
    dt = 0.1

    n_events = 5
    X = jax.random.normal(k_x, (n_events, D, 2), jnp.float32)
    M = jnp.array([[1, 1, 0, 1],
                   [1, 0, 1, 1],
                   [1, 1, 1, 0],
                   [1, 1, 1, 1],
                   [0, 1, 1, 1]], jnp.float32)
    batch_idx = jnp.array([0, 1, 0, 0, 1], jnp.int32)

    Xcat, Mf, OBS, nsteps, lflag = build_schedule(
        obs_times, event_pt, X, M, batch_idx, dt)

    losses = cogruode_forward(packed, Xcat, Mf, OBS, nsteps, lflag, dt=dt)
    losses = jax.block_until_ready(losses)

    assert all(bool(jnp.isfinite(l)) for l in losses)
    print("KERNEL_OK")
</pallas_src>

<mosaic_0001>
module attributes {stable_mosaic.version = 11 : i64} {
  func.func @_cogruode_kernel(%arg0: i32, %arg1: memref<3xi32, #tpu.memory_space<smem>>, %arg2: memref<3xi32, #tpu.memory_space<smem>>, %arg3: memref<1x2x8xf32, #tpu.memory_space<vmem>>, %arg4: memref<1x2x4xf32, #tpu.memory_space<vmem>>, %arg5: memref<1x2x1xf32, #tpu.memory_space<vmem>>, %arg6: memref<32x64xf32, #tpu.memory_space<vmem>>, %arg7: memref<32x32xf32, #tpu.memory_space<vmem>>, %arg8: memref<1x64xf32, #tpu.memory_space<vmem>>, %arg9: memref<1x32xf32, #tpu.memory_space<vmem>>, %arg10: memref<32x64xf32, #tpu.memory_space<vmem>>, %arg11: memref<32x32xf32, #tpu.memory_space<vmem>>, %arg12: memref<1x64xf32, #tpu.memory_space<vmem>>, %arg13: memref<1x32xf32, #tpu.memory_space<vmem>>, %arg14: memref<8x96xf32, #tpu.memory_space<vmem>>, %arg15: memref<32x64xf32, #tpu.memory_space<vmem>>, %arg16: memref<32x32xf32, #tpu.memory_space<vmem>>, %arg17: memref<1x64xf32, #tpu.memory_space<vmem>>, %arg18: memref<1x32xf32, #tpu.memory_space<vmem>>, %arg19: memref<32x96xf32, #tpu.memory_space<vmem>>, %arg20: memref<32x64xf32, #tpu.memory_space<vmem>>, %arg21: memref<32x32xf32, #tpu.memory_space<vmem>>, %arg22: memref<1x64xf32, #tpu.memory_space<vmem>>, %arg23: memref<1x32xf32, #tpu.memory_space<vmem>>, %arg24: memref<4x32xf32, #tpu.memory_space<vmem>>, %arg25: memref<32x64xf32, #tpu.memory_space<vmem>>, %arg26: memref<32x64xf32, #tpu.memory_space<vmem>>, %arg27: memref<1x64xf32, #tpu.memory_space<vmem>>, %arg28: memref<64x3xf32, #tpu.memory_space<vmem>>, %arg29: memref<1x3xf32, #tpu.memory_space<vmem>>, %arg30: memref<1x1xf32, #tpu.memory_space<vmem>>, %arg31: memref<1x1xf32, #tpu.memory_space<vmem>>, %arg32: memref<1x1xf32, #tpu.memory_space<vmem>>, %arg33: memref<1x1xf32, #tpu.memory_space<vmem>>, %arg34: memref<2x32xf32, #tpu.memory_space<vmem>>, %arg35: memref<2x32xf32, #tpu.memory_space<vmem>>) attributes {dimension_semantics = [#tpu.dimension_semantics<arbitrary>], iteration_bounds = array<i64: 3>, scalar_prefetch = 2 : i64, scratch_operands = 2 : i64, tpu.core_type = #tpu.core_type<tc>, window_params = [{transform_indices = @transform_0, window_bounds = array<i64: 1, 2, 8>}, {transform_indices = @transform_1, window_bounds = array<i64: 1, 2, 4>}, {transform_indices = @transform_2, window_bounds = array<i64: 1, 2, 1>}, {pipeline_mode = #tpu.pipeline_mode<synchronous>, transform_indices = @transform_3, window_bounds = array<i64: 32, 64>}, {pipeline_mode = #tpu.pipeline_mode<synchronous>, transform_indices = @transform_4, window_bounds = array<i64: 32, 32>}, {pipeline_mode = #tpu.pipeline_mode<synchronous>, transform_indices = @transform_5, window_bounds = array<i64: 1, 64>}, {pipeline_mode = #tpu.pipeline_mode<synchronous>, transform_indices = @transform_6, window_bounds = array<i64: 1, 32>}, {pipeline_mode = #tpu.pipeline_mode<synchronous>, transform_indices = @transform_7, window_bounds = array<i64: 32, 64>}, {pipeline_mode = #tpu.pipeline_mode<synchronous>, transform_indices = @transform_8, window_bounds = array<i64: 32, 32>}, {pipeline_mode = #tpu.pipeline_mode<synchronous>, transform_indices = @transform_9, window_bounds = array<i64: 1, 64>}, {pipeline_mode = #tpu.pipeline_mode<synchronous>, transform_indices = @transform_10, window_bounds = array<i64: 1, 32>}, {pipeline_mode = #tpu.pipeline_mode<synchronous>, transform_indices = @transform_11, window_bounds = array<i64: 8, 96>}, {pipeline_mode = #tpu.pipeline_mode<synchronous>, transform_indices = @transform_12, window_bounds = array<i64: 32, 64>}, {pipeline_mode = #tpu.pipeline_mode<synchronous>, transform_indices = @transform_13, window_bounds = array<i64: 32, 32>}, {pipeline_mode = #tpu.pipeline_mode<synchronous>, transform_indices = @transform_14, window_bounds = array<i64: 1, 64>}, {pipeline_mode = #tpu.pipeline_mode<synchronous>, transform_indices = @transform_15, window_bounds = array<i64: 1, 32>}, {pipeline_mode = #tpu.pipeline_mode<synchronous>, transform_indices = @transform_16, window_bounds = array<i64: 32, 96>}, {pipeline_mode = #tpu.pipeline_mode<synchronous>, transform_indices = @transform_17, window_bounds = array<i64: 32, 64>}, {pipeline_mode = #tpu.pipeline_mode<synchronous>, transform_indices = @transform_18, window_bounds = array<i64: 32, 32>}, {pipeline_mode = #tpu.pipeline_mode<synchronous>, transform_indices = @transform_19, window_bounds = array<i64: 1, 64>}, {pipeline_mode = #tpu.pipeline_mode<synchronous>, transform_indices = @transform_20, window_bounds = array<i64: 1, 32>}, {pipeline_mode = #tpu.pipeline_mode<synchronous>, transform_indices = @transform_21, window_bounds = array<i64: 4, 32>}, {pipeline_mode = #tpu.pipeline_mode<synchronous>, transform_indices = @transform_22, window_bounds = array<i64: 32, 64>}, {pipeline_mode = #tpu.pipeline_mode<synchronous>, transform_indices = @transform_23, window_bounds = array<i64: 32, 64>}, {pipeline_mode = #tpu.pipeline_mode<synchronous>, transform_indices = @transform_24, window_bounds = array<i64: 1, 64>}, {pipeline_mode = #tpu.pipeline_mode<synchronous>, transform_indices = @transform_25, window_bounds = array<i64: 64, 3>}, {pipeline_mode = #tpu.pipeline_mode<synchronous>, transform_indices = @transform_26, window_bounds = array<i64: 1, 3>}, {pipeline_mode = #tpu.pipeline_mode<synchronous>, transform_indices = @transform_27, window_bounds = array<i64: 1, 1>}, {pipeline_mode = #tpu.pipeline_mode<synchronous>, transform_indices = @transform_28, window_bounds = array<i64: 1, 1>}, {pipeline_mode = #tpu.pipeline_mode<synchronous>, transform_indices = @transform_29, window_bounds = array<i64: 1, 1>}, {pipeline_mode = #tpu.pipeline_mode<synchronous>, transform_indices = @transform_30, window_bounds = array<i64: 1, 1>}]} {
    %c0_i32 = arith.constant 0 : i32
    %0 = arith.cmpi eq, %arg0, %c0_i32 : i32
    %1 = arith.extui %0 : i1 to i32
    %c0_i32_0 = arith.constant 0 : i32
    %2 = arith.cmpi ne, %1, %c0_i32_0 : i32
    scf.if %2 {
      %cst_101 = arith.constant 0.000000e+00 : f32
      %171 = vector.broadcast %cst_101 : f32 to vector<2x32xf32>
      %c0_102 = arith.constant 0 : index
      %c0_103 = arith.constant 0 : index
      %172 = vector.load %arg34[%c0_102, %c0_103] : memref<2x32xf32, #tpu.memory_space<vmem>>, vector<2x32xf32>
      tpu.vector_store %arg34[%c0_102, %c0_103], %171 {strides = array<i32>} : memref<2x32xf32, #tpu.memory_space<vmem>>, vector<2x32xf32>,
      %cst_104 = arith.constant 0.000000e+00 : f32
      %173 = vector.broadcast %cst_104 : f32 to vector<2x32xf32>
      %c0_105 = arith.constant 0 : index
      %c0_106 = arith.constant 0 : index
      %174 = vector.load %arg35[%c0_105, %c0_106] : memref<2x32xf32, #tpu.memory_space<vmem>>, vector<2x32xf32>
      tpu.vector_store %arg35[%c0_105, %c0_106], %173 {strides = array<i32>} : memref<2x32xf32, #tpu.memory_space<vmem>>, vector<2x32xf32>,
      %cst_107 = arith.constant 0.000000e+00 : f32
      %175 = vector.broadcast %cst_107 : f32 to vector<1x1xf32>
      %c0_108 = arith.constant 0 : index
      %c0_109 = arith.constant 0 : index
      %176 = vector.load %arg30[%c0_108, %c0_109] : memref<1x1xf32, #tpu.memory_space<vmem>>, vector<1x1xf32>
      tpu.vector_store %arg30[%c0_108, %c0_109], %175 {strides = array<i32>} : memref<1x1xf32, #tpu.memory_space<vmem>>, vector<1x1xf32>,
      %cst_110 = arith.constant 0.000000e+00 : f32
      %177 = vector.broadcast %cst_110 : f32 to vector<1x1xf32>
      %c0_111 = arith.constant 0 : index
      %c0_112 = arith.constant 0 : index
      %178 = vector.load %arg31[%c0_111, %c0_112] : memref<1x1xf32, #tpu.memory_space<vmem>>, vector<1x1xf32>
      tpu.vector_store %arg31[%c0_111, %c0_112], %177 {strides = array<i32>} : memref<1x1xf32, #tpu.memory_space<vmem>>, vector<1x1xf32>,
      %cst_113 = arith.constant 0.000000e+00 : f32
      %179 = vector.broadcast %cst_113 : f32 to vector<1x1xf32>
      %c0_114 = arith.constant 0 : index
      %c0_115 = arith.constant 0 : index
      %180 = vector.load %arg32[%c0_114, %c0_115] : memref<1x1xf32, #tpu.memory_space<vmem>>, vector<1x1xf32>
      tpu.vector_store %arg32[%c0_114, %c0_115], %179 {strides = array<i32>} : memref<1x1xf32, #tpu.memory_space<vmem>>, vector<1x1xf32>,
      %cst_116 = arith.constant 0.000000e+00 : f32
      %181 = vector.broadcast %cst_116 : f32 to vector<1x1xf32>
      %c0_117 = arith.constant 0 : index
      %c0_118 = arith.constant 0 : index
      %182 = vector.load %arg33[%c0_117, %c0_118] : memref<1x1xf32, #tpu.memory_space<vmem>>, vector<1x1xf32>
      tpu.vector_store %arg33[%c0_117, %c0_118], %181 {strides = array<i32>} : memref<1x1xf32, #tpu.memory_space<vmem>>, vector<1x1xf32>,
    } else {
    }
    %c0 = arith.constant 0 : index
    %c0_1 = arith.constant 0 : index
    %3 = vector.load %arg6[%c0, %c0_1] : memref<32x64xf32, #tpu.memory_space<vmem>>, vector<32x64xf32>
    %c0_2 = arith.constant 0 : index
    %c0_3 = arith.constant 0 : index
    %4 = vector.load %arg7[%c0_2, %c0_3] : memref<32x32xf32, #tpu.memory_space<vmem>>, vector<32x32xf32>
    %c0_4 = arith.constant 0 : index
    %c0_5 = arith.constant 0 : index
    %5 = vector.load %arg8[%c0_4, %c0_5] : memref<1x64xf32, #tpu.memory_space<vmem>>, vector<1x64xf32>
    %c0_6 = arith.constant 0 : index
    %c0_7 = arith.constant 0 : index
    %6 = vector.load %arg9[%c0_6, %c0_7] : memref<1x32xf32, #tpu.memory_space<vmem>>, vector<1x32xf32>
    %c0_8 = arith.constant 0 : index
    %c0_9 = arith.constant 0 : index
    %7 = vector.load %arg10[%c0_8, %c0_9] : memref<32x64xf32, #tpu.memory_space<vmem>>, vector<32x64xf32>
    %c0_10 = arith.constant 0 : index
    %c0_11 = arith.constant 0 : index
    %8 = vector.load %arg11[%c0_10, %c0_11] : memref<32x32xf32, #tpu.memory_space<vmem>>, vector<32x32xf32>
    %c0_12 = arith.constant 0 : index
    %c0_13 = arith.constant 0 : index
    %9 = vector.load %arg12[%c0_12, %c0_13] : memref<1x64xf32, #tpu.memory_space<vmem>>, vector<1x64xf32>
    %c0_14 = arith.constant 0 : index
    %c0_15 = arith.constant 0 : index
    %10 = vector.load %arg13[%c0_14, %c0_15] : memref<1x32xf32, #tpu.memory_space<vmem>>, vector<1x32xf32>
    %11 = arith.index_cast %arg0 : i32 to index
    %12 = memref.load %arg1[%11] : memref<3xi32, #tpu.memory_space<smem>>
    %c0_16 = arith.constant 0 : index
    %c0_17 = arith.constant 0 : index
    %13 = vector.load %arg34[%c0_16, %c0_17] : memref<2x32xf32, #tpu.memory_space<vmem>>, vector<2x32xf32>
    %c0_18 = arith.constant 0 : index
    %c0_19 = arith.constant 0 : index
    %14 = vector.load %arg35[%c0_18, %c0_19] : memref<2x32xf32, #tpu.memory_space<vmem>>, vector<2x32xf32>
    %c0_i32_20 = arith.constant 0 : i32
    %15 = arith.subi %12, %c0_i32_20 : i32
    %16 = arith.addi %c0_i32_20, %15 : i32
    %c1_i32 = arith.constant 1 : i32
    %17:2 = scf.for %arg36 = %c0_i32_20 to %16 step %c1_i32 iter_args(%arg37 = %13, %arg38 = %14) -> (vector<2x32xf32>, vector<2x32xf32>)  : i32 {
      %cst_101 = arith.constant dense<0.000000e+00> : vector<2x64xf32>
      %171 = tpu.matmul %arg37, %3, %cst_101 {dimension_numbers = #tpu.dot_dimension_numbers<[1], [0], [0], [1], [0, 0, 1, 1], [], []>} : vector<2x32xf32>, vector<32x64xf32>, vector<2x64xf32> -> vector<2x64xf32>
      %172 = vector.broadcast %5 : vector<1x64xf32> to vector<2x64xf32>
      %173 = arith.addf %171, %172 : vector<2x64xf32>
      %174 = arith.negf %173 : vector<2x64xf32>
      %175 = math.exp %174 : vector<2x64xf32>
      %cst_102 = arith.constant 1.000000e+00 : f32
      %176 = vector.broadcast %cst_102 : f32 to vector<2x64xf32>
      %177 = arith.addf %176, %175 : vector<2x64xf32>
      %178 = arith.divf %176, %177 : vector<2x64xf32>
      %179 = vector.extract_strided_slice %178 {offsets = [0, 0], sizes = [2, 32], strides = [1, 1]} : vector<2x64xf32> to vector<2x32xf32>
      %180 = vector.extract_strided_slice %178 {offsets = [0, 32], sizes = [2, 32], strides = [1, 1]} : vector<2x64xf32> to vector<2x32xf32>
      %181 = arith.mulf %179, %arg37 : vector<2x32xf32>
      %cst_103 = arith.constant dense<0.000000e+00> : vector<2x32xf32>
      %182 = tpu.matmul %181, %4, %cst_103 {dimension_numbers = #tpu.dot_dimension_numbers<[1], [0], [0], [1], [0, 0, 1, 1], [], []>} : vector<2x32xf32>, vector<32x32xf32>, vector<2x32xf32> -> vector<2x32xf32>
      %183 = vector.broadcast %6 : vector<1x32xf32> to vector<2x32xf32>
      %184 = arith.addf %182, %183 : vector<2x32xf32>
      %185 = math.tanh %184 : vector<2x32xf32>
      %cst_104 = arith.constant 1.000000e+00 : f32
      %186 = vector.broadcast %cst_104 : f32 to vector<2x32xf32>
      %187 = arith.subf %186, %180 : vector<2x32xf32>
      %cst_105 = arith.constant 1.000000e-01 : f32
      %188 = vector.broadcast %cst_105 : f32 to vector<2x32xf32>
      %189 = arith.mulf %188, %187 : vector<2x32xf32>
      %190 = arith.subf %185, %arg37 : vector<2x32xf32>
      %191 = arith.mulf %189, %190 : vector<2x32xf32>
      %192 = arith.addf %arg37, %191 : vector<2x32xf32>
      %cst_106 = arith.constant dense<0.000000e+00> : vector<2x64xf32>
      %193 = tpu.matmul %arg38, %7, %cst_106 {dimension_numbers = #tpu.dot_dimension_numbers<[1], [0], [0], [1], [0, 0, 1, 1], [], []>} : vector<2x32xf32>, vector<32x64xf32>, vector<2x64xf32> -> vector<2x64xf32>
      %194 = vector.broadcast %9 : vector<1x64xf32> to vector<2x64xf32>
      %195 = arith.addf %193, %194 : vector<2x64xf32>
      %196 = arith.negf %195 : vector<2x64xf32>
      %197 = math.exp %196 : vector<2x64xf32>
      %cst_107 = arith.constant 1.000000e+00 : f32
      %198 = vector.broadcast %cst_107 : f32 to vector<2x64xf32>
      %199 = arith.addf %198, %197 : vector<2x64xf32>
      %200 = arith.divf %198, %199 : vector<2x64xf32>
      %201 = vector.extract_strided_slice %200 {offsets = [0, 0], sizes = [2, 32], strides = [1, 1]} : vector<2x64xf32> to vector<2x32xf32>
      %202 = vector.extract_strided_slice %200 {offsets = [0, 32], sizes = [2, 32], strides = [1, 1]} : vector<2x64xf32> to vector<2x32xf32>
      %203 = arith.mulf %arg38, %201 : vector<2x32xf32>
      %cst_108 = arith.constant dense<0.000000e+00> : vector<2x32xf32>
      %204 = tpu.matmul %203, %8, %cst_108 {dimension_numbers = #tpu.dot_dimension_numbers<[1], [0], [0], [1], [0, 0, 1, 1], [], []>} : vector<2x32xf32>, vector<32x32xf32>, vector<2x32xf32> -> vector<2x32xf32>
      %205 = vector.broadcast %10 : vector<1x32xf32> to vector<2x32xf32>
      %206 = arith.addf %204, %205 : vector<2x32xf32>
      %207 = math.tanh %206 : vector<2x32xf32>
      %cst_109 = arith.constant 1.000000e+00 : f32
      %208 = vector.broadcast %cst_109 : f32 to vector<2x32xf32>
      %209 = arith.subf %208, %202 : vector<2x32xf32>
      %cst_110 = arith.constant 1.000000e-01 : f32
      %210 = vector.broadcast %cst_110 : f32 to vector<2x32xf32>
      %211 = arith.mulf %210, %209 : vector<2x32xf32>
      %212 = arith.subf %207, %arg38 : vector<2x32xf32>
      %213 = arith.mulf %211, %212 : vector<2x32xf32>
      %214 = arith.addf %arg38, %213 : vector<2x32xf32>
      scf.yield %192, %214 : vector<2x32xf32>, vector<2x32xf32>
    }
    %c0_21 = arith.constant 0 : index
    %c0_22 = arith.constant 0 : index
    %18 = vector.load %arg25[%c0_21, %c0_22] : memref<32x64xf32, #tpu.memory_space<vmem>>, vector<32x64xf32>
    %cst = arith.constant dense<0.000000e+00> : vector<2x64xf32>
    %19 = tpu.matmul %17#0, %18, %cst {dimension_numbers = #tpu.dot_dimension_numbers<[1], [0], [0], [1], [0, 0, 1, 1], [], []>} : vector<2x32xf32>, vector<32x64xf32>, vector<2x64xf32> -> vector<2x64xf32>
    %c0_23 = arith.constant 0 : index
    %c0_24 = arith.constant 0 : index
    %20 = vector.load %arg26[%c0_23, %c0_24] : memref<32x64xf32, #tpu.memory_space<vmem>>, vector<32x64xf32>
    %cst_25 = arith.constant dense<0.000000e+00> : vector<2x64xf32>
    %21 = tpu.matmul %17#1, %20, %cst_25 {dimension_numbers = #tpu.dot_dimension_numbers<[1], [0], [0], [1], [0, 0, 1, 1], [], []>} : vector<2x32xf32>, vector<32x64xf32>, vector<2x64xf32> -> vector<2x64xf32>
    %22 = arith.addf %19, %21 : vector<2x64xf32>
    %c0_26 = arith.constant 0 : index
    %c0_27 = arith.constant 0 : index
    %23 = vector.load %arg27[%c0_26, %c0_27] : memref<1x64xf32, #tpu.memory_space<vmem>>, vector<1x64xf32>
    %24 = vector.broadcast %23 : vector<1x64xf32> to vector<2x64xf32>
    %25 = arith.addf %22, %24 : vector<2x64xf32>
    %cst_28 = arith.constant 0.000000e+00 : f32
    %26 = vector.broadcast %cst_28 : f32 to vector<2x64xf32>
    %27 = arith.maximumf %25, %26 : vector<2x64xf32>
    %c0_29 = arith.constant 0 : index
    %c0_30 = arith.constant 0 : index
    %28 = vector.load %arg28[%c0_29, %c0_30] : memref<64x3xf32, #tpu.memory_space<vmem>>, vector<64x3xf32>
    %cst_31 = arith.constant dense<0.000000e+00> : vector<2x3xf32>
    %29 = tpu.matmul %27, %28, %cst_31 {dimension_numbers = #tpu.dot_dimension_numbers<[1], [0], [0], [1], [0, 0, 1, 1], [], []>} : vector<2x64xf32>, vector<64x3xf32>, vector<2x3xf32> -> vector<2x3xf32>
    %c0_32 = arith.constant 0 : index
    %c0_33 = arith.constant 0 : index
    %30 = vector.load %arg29[%c0_32, %c0_33] : memref<1x3xf32, #tpu.memory_space<vmem>>, vector<1x3xf32>
    %31 = vector.broadcast %30 : vector<1x3xf32> to vector<2x3xf32>
    %32 = arith.addf %29, %31 : vector<2x3xf32>
    %c0_34 = arith.constant 0 : index
    %c0_35 = arith.constant 0 : index
    %c0_36 = arith.constant 0 : index
    %33 = vector.load %arg3[%c0_34, %c0_35, %c0_36] : memref<1x2x8xf32, #tpu.memory_space<vmem>>, vector<1x2x8xf32>
    %34 = vector.shape_cast %33 : vector<1x2x8xf32> to vector<2x8xf32>
    %c0_37 = arith.constant 0 : index
    %c0_38 = arith.constant 0 : index
    %c0_39 = arith.constant 0 : index
    %35 = vector.load %arg4[%c0_37, %c0_38, %c0_39] : memref<1x2x4xf32, #tpu.memory_space<vmem>>, vector<1x2x4xf32>
    %36 = vector.shape_cast %35 : vector<1x2x4xf32> to vector<2x4xf32>
    %c0_40 = arith.constant 0 : index
    %c0_41 = arith.constant 0 : index
    %c0_42 = arith.constant 0 : index
    %37 = vector.load %arg5[%c0_40, %c0_41, %c0_42] : memref<1x2x1xf32, #tpu.memory_space<vmem>>, vector<1x2x1xf32>
    %38 = vector.shape_cast %37 : vector<1x2x1xf32> to vector<2x1xf32>
    %39 = arith.index_cast %arg0 : i32 to index
    %40 = memref.load %arg2[%39] : memref<3xi32, #tpu.memory_space<smem>>
    %41 = arith.sitofp %40 : i32 to f32
    %42 = vector.extract_strided_slice %34 {offsets = [0, 1], sizes = [2, 3], strides = [1, 1]} : vector<2x8xf32> to vector<2x3xf32>
    %43 = vector.extract_strided_slice %36 {offsets = [0, 1], sizes = [2, 3], strides = [1, 1]} : vector<2x4xf32> to vector<2x3xf32>
    %44 = vector.broadcast %38 : vector<2x1xf32> to vector<2x3xf32>
    %45 = arith.mulf %43, %44 : vector<2x3xf32>
    %46 = arith.subf %42, %32 : vector<2x3xf32>
    %c0_43 = arith.constant 0 : index
    %c0_44 = arith.constant 0 : index
    %47 = vector.load %arg30[%c0_43, %c0_44] : memref<1x1xf32, #tpu.memory_space<vmem>>, vector<1x1xf32>
    %48 = arith.mulf %46, %46 : vector<2x3xf32>
    %49 = arith.mulf %48, %45 : vector<2x3xf32>
    %50 = vector.shape_cast %49 : vector<2x3xf32> to vector<1x2x3xf32>
    %cst_45 = arith.constant dense<0.000000e+00> : vector<1xf32>
    %51 = vector.multi_reduction <add>, %50, %cst_45 [1, 2] : vector<1x2x3xf32> to vector<1xf32>
    %52 = vector.shape_cast %51 : vector<1xf32> to vector<1x1x1xf32>
    %53 = vector.extract %52[0, 0, 0] : f32 from vector<1x1x1xf32>
    %54 = vector.broadcast %53 : f32 to vector<1x1xf32>
    %55 = vector.broadcast %41 : f32 to vector<1x1xf32>
    %56 = arith.mulf %55, %54 : vector<1x1xf32>
    %57 = arith.addf %47, %56 : vector<1x1xf32>
    %c0_46 = arith.constant 0 : index
    %c0_47 = arith.constant 0 : index
    %58 = vector.load %arg30[%c0_46, %c0_47] : memref<1x1xf32, #tpu.memory_space<vmem>>, vector<1x1xf32>
    tpu.vector_store %arg30[%c0_46, %c0_47], %57 {strides = array<i32>} : memref<1x1xf32, #tpu.memory_space<vmem>>, vector<1x1xf32>,
    %c0_48 = arith.constant 0 : index
    %c0_49 = arith.constant 0 : index
    %59 = vector.load %arg31[%c0_48, %c0_49] : memref<1x1xf32, #tpu.memory_space<vmem>>, vector<1x1xf32>
    %60 = math.absf %46 : vector<2x3xf32>
    %61 = arith.mulf %60, %45 : vector<2x3xf32>
    %62 = vector.shape_cast %61 : vector<2x3xf32> to vector<1x2x3xf32>
    %cst_50 = arith.constant dense<0.000000e+00> : vector<1xf32>
    %63 = vector.multi_reduction <add>, %62, %cst_50 [1, 2] : vector<1x2x3xf32> to vector<1xf32>
    %64 = vector.shape_cast %63 : vector<1xf32> to vector<1x1x1xf32>
    %65 = vector.extract %64[0, 0, 0] : f32 from vector<1x1x1xf32>
    %66 = vector.broadcast %65 : f32 to vector<1x1xf32>
    %67 = vector.broadcast %41 : f32 to vector<1x1xf32>
    %68 = arith.mulf %67, %66 : vector<1x1xf32>
    %69 = arith.addf %59, %68 : vector<1x1xf32>
    %c0_51 = arith.constant 0 : index
    %c0_52 = arith.constant 0 : index
    %70 = vector.load %arg31[%c0_51, %c0_52] : memref<1x1xf32, #tpu.memory_space<vmem>>, vector<1x1xf32>
    tpu.vector_store %arg31[%c0_51, %c0_52], %69 {strides = array<i32>} : memref<1x1xf32, #tpu.memory_space<vmem>>, vector<1x1xf32>,
    %c0_53 = arith.constant 0 : index
    %c0_54 = arith.constant 0 : index
    %71 = vector.load %arg32[%c0_53, %c0_54] : memref<1x1xf32, #tpu.memory_space<vmem>>, vector<1x1xf32>
    %72 = math.absf %46 : vector<2x3xf32>
    %cst_55 = arith.constant 9.99999993E-9 : f32
    %73 = vector.broadcast %cst_55 : f32 to vector<2x3xf32>
    %74 = arith.addf %42, %73 : vector<2x3xf32>
    %75 = arith.divf %72, %74 : vector<2x3xf32>
    %76 = arith.mulf %75, %45 : vector<2x3xf32>
    %77 = vector.shape_cast %76 : vector<2x3xf32> to vector<1x2x3xf32>
    %cst_56 = arith.constant dense<0.000000e+00> : vector<1xf32>
    %78 = vector.multi_reduction <add>, %77, %cst_56 [1, 2] : vector<1x2x3xf32> to vector<1xf32>
    %79 = vector.shape_cast %78 : vector<1xf32> to vector<1x1x1xf32>
    %80 = vector.extract %79[0, 0, 0] : f32 from vector<1x1x1xf32>
    %81 = vector.broadcast %80 : f32 to vector<1x1xf32>
    %82 = vector.broadcast %41 : f32 to vector<1x1xf32>
    %83 = arith.mulf %82, %81 : vector<1x1xf32>
    %84 = arith.addf %71, %83 : vector<1x1xf32>
    %c0_57 = arith.constant 0 : index
    %c0_58 = arith.constant 0 : index
    %85 = vector.load %arg32[%c0_57, %c0_58] : memref<1x1xf32, #tpu.memory_space<vmem>>, vector<1x1xf32>
    tpu.vector_store %arg32[%c0_57, %c0_58], %84 {strides = array<i32>} : memref<1x1xf32, #tpu.memory_space<vmem>>, vector<1x1xf32>,
    %c0_59 = arith.constant 0 : index
    %c0_60 = arith.constant 0 : index
    %86 = vector.load %arg33[%c0_59, %c0_60] : memref<1x1xf32, #tpu.memory_space<vmem>>, vector<1x1xf32>
    %87 = vector.shape_cast %45 : vector<2x3xf32> to vector<1x2x3xf32>
    %cst_61 = arith.constant dense<0.000000e+00> : vector<1xf32>
    %88 = vector.multi_reduction <add>, %87, %cst_61 [1, 2] : vector<1x2x3xf32> to vector<1xf32>
    %89 = vector.shape_cast %88 : vector<1xf32> to vector<1x1x1xf32>
    %90 = vector.extract %89[0, 0, 0] : f32 from vector<1x1x1xf32>
    %91 = vector.broadcast %90 : f32 to vector<1x1xf32>
    %92 = vector.broadcast %41 : f32 to vector<1x1xf32>
    %93 = arith.mulf %92, %91 : vector<1x1xf32>
    %94 = arith.addf %86, %93 : vector<1x1xf32>
    %c0_62 = arith.constant 0 : index
    %c0_63 = arith.constant 0 : index
    %95 = vector.load %arg33[%c0_62, %c0_63] : memref<1x1xf32, #tpu.memory_space<vmem>>, vector<1x1xf32>
    tpu.vector_store %arg33[%c0_62, %c0_63], %94 {strides = array<i32>} : memref<1x1xf32, #tpu.memory_space<vmem>>, vector<1x1xf32>,
    %c0_64 = arith.constant 0 : index
    %c0_65 = arith.constant 0 : index
    %96 = vector.load %arg14[%c0_64, %c0_65] : memref<8x96xf32, #tpu.memory_space<vmem>>, vector<8x96xf32>
    %cst_66 = arith.constant dense<0.000000e+00> : vector<2x96xf32>
    %97 = tpu.matmul %34, %96, %cst_66 {dimension_numbers = #tpu.dot_dimension_numbers<[1], [0], [0], [1], [0, 0, 1, 1], [], []>} : vector<2x8xf32>, vector<8x96xf32>, vector<2x96xf32> -> vector<2x96xf32>
    %98 = vector.extract_strided_slice %97 {offsets = [0, 0], sizes = [2, 64], strides = [1, 1]} : vector<2x96xf32> to vector<2x64xf32>
    %c0_67 = arith.constant 0 : index
    %c0_68 = arith.constant 0 : index
    %99 = vector.load %arg15[%c0_67, %c0_68] : memref<32x64xf32, #tpu.memory_space<vmem>>, vector<32x64xf32>
    %cst_69 = arith.constant dense<0.000000e+00> : vector<2x64xf32>
    %100 = tpu.matmul %17#0, %99, %cst_69 {dimension_numbers = #tpu.dot_dimension_numbers<[1], [0], [0], [1], [0, 0, 1, 1], [], []>} : vector<2x32xf32>, vector<32x64xf32>, vector<2x64xf32> -> vector<2x64xf32>
    %101 = arith.addf %98, %100 : vector<2x64xf32>
    %c0_70 = arith.constant 0 : index
    %c0_71 = arith.constant 0 : index
    %102 = vector.load %arg17[%c0_70, %c0_71] : memref<1x64xf32, #tpu.memory_space<vmem>>, vector<1x64xf32>
    %103 = vector.broadcast %102 : vector<1x64xf32> to vector<2x64xf32>
    %104 = arith.addf %101, %103 : vector<2x64xf32>
    %105 = arith.negf %104 : vector<2x64xf32>
    %106 = math.exp %105 : vector<2x64xf32>
    %cst_72 = arith.constant 1.000000e+00 : f32
    %107 = vector.broadcast %cst_72 : f32 to vector<2x64xf32>
    %108 = arith.addf %107, %106 : vector<2x64xf32>
    %109 = arith.divf %107, %108 : vector<2x64xf32>
    %110 = vector.extract_strided_slice %109 {offsets = [0, 0], sizes = [2, 32], strides = [1, 1]} : vector<2x64xf32> to vector<2x32xf32>
    %111 = vector.extract_strided_slice %109 {offsets = [0, 32], sizes = [2, 32], strides = [1, 1]} : vector<2x64xf32> to vector<2x32xf32>
    %112 = vector.extract_strided_slice %97 {offsets = [0, 64], sizes = [2, 32], strides = [1, 1]} : vector<2x96xf32> to vector<2x32xf32>
    %113 = arith.mulf %110, %17#0 : vector<2x32xf32>
    %c0_73 = arith.constant 0 : index
    %c0_74 = arith.constant 0 : index
    %114 = vector.load %arg16[%c0_73, %c0_74] : memref<32x32xf32, #tpu.memory_space<vmem>>, vector<32x32xf32>
    %cst_75 = arith.constant dense<0.000000e+00> : vector<2x32xf32>
    %115 = tpu.matmul %113, %114, %cst_75 {dimension_numbers = #tpu.dot_dimension_numbers<[1], [0], [0], [1], [0, 0, 1, 1], [], []>} : vector<2x32xf32>, vector<32x32xf32>, vector<2x32xf32> -> vector<2x32xf32>
    %116 = arith.addf %112, %115 : vector<2x32xf32>
    %c0_76 = arith.constant 0 : index
    %c0_77 = arith.constant 0 : index
    %117 = vector.load %arg18[%c0_76, %c0_77] : memref<1x32xf32, #tpu.memory_space<vmem>>, vector<1x32xf32>
    %118 = vector.broadcast %117 : vector<1x32xf32> to vector<2x32xf32>
    %119 = arith.addf %116, %118 : vector<2x32xf32>
    %120 = math.tanh %119 : vector<2x32xf32>
    %121 = arith.mulf %111, %17#0 : vector<2x32xf32>
    %cst_78 = arith.constant 1.000000e+00 : f32
    %122 = vector.broadcast %cst_78 : f32 to vector<2x32xf32>
    %123 = arith.subf %122, %111 : vector<2x32xf32>
    %124 = arith.mulf %123, %120 : vector<2x32xf32>
    %125 = arith.addf %121, %124 : vector<2x32xf32>
    %c0_79 = arith.constant 0 : index
    %c0_80 = arith.constant 0 : index
    %126 = vector.load %arg24[%c0_79, %c0_80] : memref<4x32xf32, #tpu.memory_space<vmem>>, vector<4x32xf32>
    %cst_81 = arith.constant dense<0.000000e+00> : vector<2x32xf32>
    %127 = tpu.matmul %36, %126, %cst_81 {dimension_numbers = #tpu.dot_dimension_numbers<[1], [0], [0], [1], [0, 0, 1, 1], [], []>} : vector<2x4xf32>, vector<4x32xf32>, vector<2x32xf32> -> vector<2x32xf32>
    %cst_82 = arith.constant 1.000000e+00 : f32
    %128 = vector.broadcast %cst_82 : f32 to vector<2x32xf32>
    %129 = arith.subf %128, %127 : vector<2x32xf32>
    %130 = arith.mulf %17#0, %129 : vector<2x32xf32>
    %131 = arith.mulf %125, %127 : vector<2x32xf32>
    %132 = arith.addf %130, %131 : vector<2x32xf32>
    %133 = arith.subf %132, %17#0 : vector<2x32xf32>
    %134 = vector.broadcast %38 : vector<2x1xf32> to vector<2x32xf32>
    %135 = arith.mulf %134, %133 : vector<2x32xf32>
    %136 = arith.addf %17#0, %135 : vector<2x32xf32>
    %c0_83 = arith.constant 0 : index
    %c0_84 = arith.constant 0 : index
    %137 = vector.load %arg19[%c0_83, %c0_84] : memref<32x96xf32, #tpu.memory_space<vmem>>, vector<32x96xf32>
    %cst_85 = arith.constant dense<0.000000e+00> : vector<2x96xf32>
    %138 = tpu.matmul %136, %137, %cst_85 {dimension_numbers = #tpu.dot_dimension_numbers<[1], [0], [0], [1], [0, 0, 1, 1], [], []>} : vector<2x32xf32>, vector<32x96xf32>, vector<2x96xf32> -> vector<2x96xf32>
    %139 = vector.extract_strided_slice %138 {offsets = [0, 0], sizes = [2, 64], strides = [1, 1]} : vector<2x96xf32> to vector<2x64xf32>
    %c0_86 = arith.constant 0 : index
    %c0_87 = arith.constant 0 : index
    %140 = vector.load %arg20[%c0_86, %c0_87] : memref<32x64xf32, #tpu.memory_space<vmem>>, vector<32x64xf32>
    %cst_88 = arith.constant dense<0.000000e+00> : vector<2x64xf32>
    %141 = tpu.matmul %17#1, %140, %cst_88 {dimension_numbers = #tpu.dot_dimension_numbers<[1], [0], [0], [1], [0, 0, 1, 1], [], []>} : vector<2x32xf32>, vector<32x64xf32>, vector<2x64xf32> -> vector<2x64xf32>
    %142 = arith.addf %139, %141 : vector<2x64xf32>
    %c0_89 = arith.constant 0 : index
    %c0_90 = arith.constant 0 : index
    %143 = vector.load %arg22[%c0_89, %c0_90] : memref<1x64xf32, #tpu.memory_space<vmem>>, vector<1x64xf32>
    %144 = vector.broadcast %143 : vector<1x64xf32> to vector<2x64xf32>
    %145 = arith.addf %142, %144 : vector<2x64xf32>
    %146 = arith.negf %145 : vector<2x64xf32>
    %147 = math.exp %146 : vector<2x64xf32>
    %cst_91 = arith.constant 1.000000e+00 : f32
    %148 = vector.broadcast %cst_91 : f32 to vector<2x64xf32>
    %149 = arith.addf %148, %147 : vector<2x64xf32>
    %150 = arith.divf %148, %149 : vector<2x64xf32>
    %151 = vector.extract_strided_slice %150 {offsets = [0, 0], sizes = [2, 32], strides = [1, 1]} : vector<2x64xf32> to vector<2x32xf32>
    %152 = vector.extract_strided_slice %150 {offsets = [0, 32], sizes = [2, 32], strides = [1, 1]} : vector<2x64xf32> to vector<2x32xf32>
    %153 = vector.extract_strided_slice %138 {offsets = [0, 64], sizes = [2, 32], strides = [1, 1]} : vector<2x96xf32> to vector<2x32xf32>
    %154 = arith.mulf %17#1, %151 : vector<2x32xf32>
    %c0_92 = arith.constant 0 : index
    %c0_93 = arith.constant 0 : index
    %155 = vector.load %arg21[%c0_92, %c0_93] : memref<32x32xf32, #tpu.memory_space<vmem>>, vector<32x32xf32>
    %cst_94 = arith.constant dense<0.000000e+00> : vector<2x32xf32>
    %156 = tpu.matmul %154, %155, %cst_94 {dimension_numbers = #tpu.dot_dimension_numbers<[1], [0], [0], [1], [0, 0, 1, 1], [], []>} : vector<2x32xf32>, vector<32x32xf32>, vector<2x32xf32> -> vector<2x32xf32>
    %157 = arith.addf %153, %156 : vector<2x32xf32>
    %c0_95 = arith.constant 0 : index
    %c0_96 = arith.constant 0 : index
    %158 = vector.load %arg23[%c0_95, %c0_96] : memref<1x32xf32, #tpu.memory_space<vmem>>, vector<1x32xf32>
    %159 = vector.broadcast %158 : vector<1x32xf32> to vector<2x32xf32>
    %160 = arith.addf %157, %159 : vector<2x32xf32>
    %161 = math.tanh %160 : vector<2x32xf32>
    %162 = arith.subf %17#1, %161 : vector<2x32xf32>
    %163 = arith.mulf %152, %162 : vector<2x32xf32>
    %164 = arith.addf %161, %163 : vector<2x32xf32>
    %165 = arith.subf %164, %17#1 : vector<2x32xf32>
    %166 = vector.broadcast %38 : vector<2x1xf32> to vector<2x32xf32>
    %167 = arith.mulf %166, %165 : vector<2x32xf32>
    %168 = arith.addf %17#1, %167 : vector<2x32xf32>
    %c0_97 = arith.constant 0 : index
    %c0_98 = arith.constant 0 : index
    %169 = vector.load %arg34[%c0_97, %c0_98] : memref<2x32xf32, #tpu.memory_space<vmem>>, vector<2x32xf32>
    tpu.vector_store %arg34[%c0_97, %c0_98], %136 {strides = array<i32>} : memref<2x32xf32, #tpu.memory_space<vmem>>, vector<2x32xf32>,
    %c0_99 = arith.constant 0 : index
    %c0_100 = arith.constant 0 : index
    %170 = vector.load %arg35[%c0_99, %c0_100] : memref<2x32xf32, #tpu.memory_space<vmem>>, vector<2x32xf32>
    tpu.vector_store %arg35[%c0_99, %c0_100], %168 {strides = array<i32>} : memref<2x32xf32, #tpu.memory_space<vmem>>, vector<2x32xf32>,
    return
  }
  func.func @transform_0(%arg0: i32, %arg1: memref<3xi32, #tpu.memory_space<smem>>, %arg2: memref<3xi32, #tpu.memory_space<smem>>) -> (i32, i32, i32) {
    %c0_i32 = arith.constant 0 : i32
    %c0_i32_0 = arith.constant 0 : i32
    %c0_i32_1 = arith.constant 0 : i32
    return %arg0, %c0_i32, %c0_i32_0 : i32, i32, i32
  }
  func.func @transform_1(%arg0: i32, %arg1: memref<3xi32, #tpu.memory_space<smem>>, %arg2: memref<3xi32, #tpu.memory_space<smem>>) -> (i32, i32, i32) {
    %c0_i32 = arith.constant 0 : i32
    %c0_i32_0 = arith.constant 0 : i32
    %c0_i32_1 = arith.constant 0 : i32
    return %arg0, %c0_i32, %c0_i32_0 : i32, i32, i32
  }
  func.func @transform_2(%arg0: i32, %arg1: memref<3xi32, #tpu.memory_space<smem>>, %arg2: memref<3xi32, #tpu.memory_space<smem>>) -> (i32, i32, i32) {
    %c0_i32 = arith.constant 0 : i32
    %c0_i32_0 = arith.constant 0 : i32
    %c0_i32_1 = arith.constant 0 : i32
    return %arg0, %c0_i32, %c0_i32_0 : i32, i32, i32
  }
  func.func @transform_3(%arg0: i32, %arg1: memref<3xi32, #tpu.memory_space<smem>>, %arg2: memref<3xi32, #tpu.memory_space<smem>>) -> (i32, i32) {
    %c0_i32 = arith.constant 0 : i32
    %c0_i32_0 = arith.constant 0 : i32
    %c0_i32_1 = arith.constant 0 : i32
    return %c0_i32, %c0_i32_0 : i32, i32
  }
  func.func @transform_4(%arg0: i32, %arg1: memref<3xi32, #tpu.memory_space<smem>>, %arg2: memref<3xi32, #tpu.memory_space<smem>>) -> (i32, i32) {
    %c0_i32 = arith.constant 0 : i32
    %c0_i32_0 = arith.constant 0 : i32
    %c0_i32_1 = arith.constant 0 : i32
    return %c0_i32, %c0_i32_0 : i32, i32
  }
  func.func @transform_5(%arg0: i32, %arg1: memref<3xi32, #tpu.memory_space<smem>>, %arg2: memref<3xi32, #tpu.memory_space<smem>>) -> (i32, i32) {
    %c0_i32 = arith.constant 0 : i32
    %c0_i32_0 = arith.constant 0 : i32
    %c0_i32_1 = arith.constant 0 : i32
    return %c0_i32, %c0_i32_0 : i32, i32
  }
  func.func @transform_6(%arg0: i32, %arg1: memref<3xi32, #tpu.memory_space<smem>>, %arg2: memref<3xi32, #tpu.memory_space<smem>>) -> (i32, i32) {
    %c0_i32 = arith.constant 0 : i32
    %c0_i32_0 = arith.constant 0 : i32
    %c0_i32_1 = arith.constant 0 : i32
    return %c0_i32, %c0_i32_0 : i32, i32
  }
  func.func @transform_7(%arg0: i32, %arg1: memref<3xi32, #tpu.memory_space<smem>>, %arg2: memref<3xi32, #tpu.memory_space<smem>>) -> (i32, i32) {
    %c0_i32 = arith.constant 0 : i32
    %c0_i32_0 = arith.constant 0 : i32
    %c0_i32_1 = arith.constant 0 : i32
    return %c0_i32, %c0_i32_0 : i32, i32
  }
  func.func @transform_8(%arg0: i32, %arg1: memref<3xi32, #tpu.memory_space<smem>>, %arg2: memref<3xi32, #tpu.memory_space<smem>>) -> (i32, i32) {
    %c0_i32 = arith.constant 0 : i32
    %c0_i32_0 = arith.constant 0 : i32
    %c0_i32_1 = arith.constant 0 : i32
    return %c0_i32, %c0_i32_0 : i32, i32
  }
  func.func @transform_9(%arg0: i32, %arg1: memref<3xi32, #tpu.memory_space<smem>>, %arg2: memref<3xi32, #tpu.memory_space<smem>>) -> (i32, i32) {
    %c0_i32 = arith.constant 0 : i32
    %c0_i32_0 = arith.constant 0 : i32
    %c0_i32_1 = arith.constant 0 : i32
    return %c0_i32, %c0_i32_0 : i32, i32
  }
  func.func @transform_10(%arg0: i32, %arg1: memref<3xi32, #tpu.memory_space<smem>>, %arg2: memref<3xi32, #tpu.memory_space<smem>>) -> (i32, i32) {
    %c0_i32 = arith.constant 0 : i32
    %c0_i32_0 = arith.constant 0 : i32
    %c0_i32_1 = arith.constant 0 : i32
    return %c0_i32, %c0_i32_0 : i32, i32
  }
  func.func @transform_11(%arg0: i32, %arg1: memref<3xi32, #tpu.memory_space<smem>>, %arg2: memref<3xi32, #tpu.memory_space<smem>>) -> (i32, i32) {
    %c0_i32 = arith.constant 0 : i32
    %c0_i32_0 = arith.constant 0 : i32
    %c0_i32_1 = arith.constant 0 : i32
    return %c0_i32, %c0_i32_0 : i32, i32
  }
  func.func @transform_12(%arg0: i32, %arg1: memref<3xi32, #tpu.memory_space<smem>>, %arg2: memref<3xi32, #tpu.memory_space<smem>>) -> (i32, i32) {
    %c0_i32 = arith.constant 0 : i32
    %c0_i32_0 = arith.constant 0 : i32
    %c0_i32_1 = arith.constant 0 : i32
    return %c0_i32, %c0_i32_0 : i32, i32
  }
  func.func @transform_13(%arg0: i32, %arg1: memref<3xi32, #tpu.memory_space<smem>>, %arg2: memref<3xi32, #tpu.memory_space<smem>>) -> (i32, i32) {
    %c0_i32 = arith.constant 0 : i32
    %c0_i32_0 = arith.constant 0 : i32
    %c0_i32_1 = arith.constant 0 : i32
    return %c0_i32, %c0_i32_0 : i32, i32
  }
  func.func @transform_14(%arg0: i32, %arg1: memref<3xi32, #tpu.memory_space<smem>>, %arg2: memref<3xi32, #tpu.memory_space<smem>>) -> (i32, i32) {
    %c0_i32 = arith.constant 0 : i32
    %c0_i32_0 = arith.constant 0 : i32
    %c0_i32_1 = arith.constant 0 : i32
    return %c0_i32, %c0_i32_0 : i32, i32
  }
  func.func @transform_15(%arg0: i32, %arg1: memref<3xi32, #tpu.memory_space<smem>>, %arg2: memref<3xi32, #tpu.memory_space<smem>>) -> (i32, i32) {
    %c0_i32 = arith.constant 0 : i32
    %c0_i32_0 = arith.constant 0 : i32
    %c0_i32_1 = arith.constant 0 : i32
    return %c0_i32, %c0_i32_0 : i32, i32
  }
  func.func @transform_16(%arg0: i32, %arg1: memref<3xi32, #tpu.memory_space<smem>>, %arg2: memref<3xi32, #tpu.memory_space<smem>>) -> (i32, i32) {
    %c0_i32 = arith.constant 0 : i32
    %c0_i32_0 = arith.constant 0 : i32
    %c0_i32_1 = arith.constant 0 : i32
    return %c0_i32, %c0_i32_0 : i32, i32
  }
  func.func @transform_17(%arg0: i32, %arg1: memref<3xi32, #tpu.memory_space<smem>>, %arg2: memref<3xi32, #tpu.memory_space<smem>>) -> (i32, i32) {
    %c0_i32 = arith.constant 0 : i32
    %c0_i32_0 = arith.constant 0 : i32
    %c0_i32_1 = arith.constant 0 : i32
    return %c0_i32, %c0_i32_0 : i32, i32
  }
  func.func @transform_18(%arg0: i32, %arg1: memref<3xi32, #tpu.memory_space<smem>>, %arg2: memref<3xi32, #tpu.memory_space<smem>>) -> (i32, i32) {
    %c0_i32 = arith.constant 0 : i32
    %c0_i32_0 = arith.constant 0 : i32
    %c0_i32_1 = arith.constant 0 : i32
    return %c0_i32, %c0_i32_0 : i32, i32
  }
  func.func @transform_19(%arg0: i32, %arg1: memref<3xi32, #tpu.memory_space<smem>>, %arg2: memref<3xi32, #tpu.memory_space<smem>>) -> (i32, i32) {
    %c0_i32 = arith.constant 0 : i32
    %c0_i32_0 = arith.constant 0 : i32
    %c0_i32_1 = arith.constant 0 : i32
    return %c0_i32, %c0_i32_0 : i32, i32
  }
  func.func @transform_20(%arg0: i32, %arg1: memref<3xi32, #tpu.memory_space<smem>>, %arg2: memref<3xi32, #tpu.memory_space<smem>>) -> (i32, i32) {
    %c0_i32 = arith.constant 0 : i32
    %c0_i32_0 = arith.constant 0 : i32
    %c0_i32_1 = arith.constant 0 : i32
    return %c0_i32, %c0_i32_0 : i32, i32
  }
  func.func @transform_21(%arg0: i32, %arg1: memref<3xi32, #tpu.memory_space<smem>>, %arg2: memref<3xi32, #tpu.memory_space<smem>>) -> (i32, i32) {
    %c0_i32 = arith.constant 0 : i32
    %c0_i32_0 = arith.constant 0 : i32
    %c0_i32_1 = arith.constant 0 : i32
    return %c0_i32, %c0_i32_0 : i32, i32
  }
  func.func @transform_22(%arg0: i32, %arg1: memref<3xi32, #tpu.memory_space<smem>>, %arg2: memref<3xi32, #tpu.memory_space<smem>>) -> (i32, i32) {
    %c0_i32 = arith.constant 0 : i32
    %c0_i32_0 = arith.constant 0 : i32
    %c0_i32_1 = arith.constant 0 : i32
    return %c0_i32, %c0_i32_0 : i32, i32
  }
  func.func @transform_23(%arg0: i32, %arg1: memref<3xi32, #tpu.memory_space<smem>>, %arg2: memref<3xi32, #tpu.memory_space<smem>>) -> (i32, i32) {
    %c0_i32 = arith.constant 0 : i32
    %c0_i32_0 = arith.constant 0 : i32
    %c0_i32_1 = arith.constant 0 : i32
    return %c0_i32, %c0_i32_0 : i32, i32
  }
  func.func @transform_24(%arg0: i32, %arg1: memref<3xi32, #tpu.memory_space<smem>>, %arg2: memref<3xi32, #tpu.memory_space<smem>>) -> (i32, i32) {
    %c0_i32 = arith.constant 0 : i32
    %c0_i32_0 = arith.constant 0 : i32
    %c0_i32_1 = arith.constant 0 : i32
    return %c0_i32, %c0_i32_0 : i32, i32
  }
  func.func @transform_25(%arg0: i32, %arg1: memref<3xi32, #tpu.memory_space<smem>>, %arg2: memref<3xi32, #tpu.memory_space<smem>>) -> (i32, i32) {
    %c0_i32 = arith.constant 0 : i32
    %c0_i32_0 = arith.constant 0 : i32
    %c0_i32_1 = arith.constant 0 : i32
    return %c0_i32, %c0_i32_0 : i32, i32
  }
  func.func @transform_26(%arg0: i32, %arg1: memref<3xi32, #tpu.memory_space<smem>>, %arg2: memref<3xi32, #tpu.memory_space<smem>>) -> (i32, i32) {
    %c0_i32 = arith.constant 0 : i32
    %c0_i32_0 = arith.constant 0 : i32
    %c0_i32_1 = arith.constant 0 : i32
    return %c0_i32, %c0_i32_0 : i32, i32
  }
  func.func @transform_27(%arg0: i32, %arg1: memref<3xi32, #tpu.memory_space<smem>>, %arg2: memref<3xi32, #tpu.memory_space<smem>>) -> (i32, i32) {
    %c0_i32 = arith.constant 0 : i32
    %c0_i32_0 = arith.constant 0 : i32
    %c0_i32_1 = arith.constant 0 : i32
    return %c0_i32, %c0_i32_0 : i32, i32
  }
  func.func @transform_28(%arg0: i32, %arg1: memref<3xi32, #tpu.memory_space<smem>>, %arg2: memref<3xi32, #tpu.memory_space<smem>>) -> (i32, i32) {
    %c0_i32 = arith.constant 0 : i32
    %c0_i32_0 = arith.constant 0 : i32
    %c0_i32_1 = arith.constant 0 : i32
    return %c0_i32, %c0_i32_0 : i32, i32
  }
  func.func @transform_29(%arg0: i32, %arg1: memref<3xi32, #tpu.memory_space<smem>>, %arg2: memref<3xi32, #tpu.memory_space<smem>>) -> (i32, i32) {
    %c0_i32 = arith.constant 0 : i32
    %c0_i32_0 = arith.constant 0 : i32
    %c0_i32_1 = arith.constant 0 : i32
    return %c0_i32, %c0_i32_0 : i32, i32
  }
  func.func @transform_30(%arg0: i32, %arg1: memref<3xi32, #tpu.memory_space<smem>>, %arg2: memref<3xi32, #tpu.memory_space<smem>>) -> (i32, i32) {
    %c0_i32 = arith.constant 0 : i32
    %c0_i32_0 = arith.constant 0 : i32
    %c0_i32_1 = arith.constant 0 : i32
    return %c0_i32, %c0_i32_0 : i32, i32
  }
}

</mosaic_0001>

<bundles_post_ra>
// kernel: cogruode_forward.1
= control target key start
LH: loop header
LB: loop body
LE: loop exit
PB: predicated region body
PF: predicated region fallthrough
CT: control target
= control target key end

     0   :  { %s4352_s6 = smov 2   ;;  %s4353_s10 = smov 3   ;;  %s5129_s0 = inlined_call_operand.smem [shape: u32[33], index: -1, kind: input, shape index: {}] }
   0x1   :  { %s4432_s5 = sld [smem:[%s5129_s0]]   ;;  %s4354_s14 = smov 4  }
   0x2   :  { %s4437_s9 = sld [smem:[%s5129_s0 + %s4352_s6]]   ;;  %s4355_s18 = smov 5  }
   0x3   :  { %s4442_s13 = sld [smem:[%s5129_s0 + %s4353_s10]]   ;;  %s4356_s22 = smov 6  }
   0x4   :  { %s4447_s17 = sld [smem:[%s5129_s0 + %s4354_s14]]   ;;  %s4357_s26 = smov 7  }
   0x5   :  { %s4452_s21 = sld [smem:[%s5129_s0 + %s4355_s18]]   ;;  %s4358_s30 = smov 8  }
   0x6   :  { %s4457_s25 = sld [smem:[%s5129_s0 + %s4356_s22]]   ;;  %s4359_s4 = smov 9  }
   0x7   :  { %s4462_s29 = sld [smem:[%s5129_s0 + %s4357_s26]]   ;;  %s4360_s10 = smov 10  }
   0x8   :  { %5140 = sst [smem:[#allocation57_spill]] %s4437_s9  ;;  %s4361_s15 = smov 11  }
   0x9   :  { %5141 = sst [smem:[#allocation58_spill]] %s4442_s13  ;;  %s4362_s20 = smov 12  }
   0xa   :  { %5142 = sst [smem:[#allocation59_spill]] %s4447_s17  ;;  %s4363_s26 = smov 13  }
   0xb   :  { %5143 = sst [smem:[#allocation60_spill]] %s4452_s21  ;;  %s4364_s1 = smov 14  }
   0xc   :  { %5144 = sst [smem:[#allocation61_spill]] %s4457_s25  ;;  %s4365_s7 = smov 15  }
   0xd   :  { %s4467_s3 = sld [smem:[%s5129_s0 + %s4358_s30]]   ;;  %s4367_s22 = smov 17  }
   0xe   :  { %s4472_s8 = sld [smem:[%s5129_s0 + %s4359_s4]]   ;;  %s4368_s28 = smov 18  }
   0xf   :  { %s4477_s14 = sld [smem:[%s5129_s0 + %s4360_s10]]   ;;  %s4378_s17 = smov 28  }
  0x10   :  { %s4482_s19 = sld [smem:[%s5129_s0 + %s4361_s15]]   ;;  %s4366_s15 = smov 16  }
  0x11   :  { %s4487_s24 = sld [smem:[%s5129_s0 + %s4362_s20]]   ;;  %s4379_s13 = smov 29  }
  0x12   :  { %s4492_s30 = sld [smem:[%s5129_s0 + %s4363_s26]]   ;;  %s4380_s9 = smov 30  }
  0x13   :  { %5145 = sst [smem:[#allocation62_spill]] %s4467_s3 }
  0x14   :  { %s4497_s6 = sld [smem:[%s5129_s0 + %s4364_s1]]  }
  0x15   :  { %s4502_s12 = sld [smem:[%s5129_s0 + %s4365_s7]]   ;;  %s4369_s7 = smov 19  }
  0x16   :  { %s4507_s20 = sld [smem:[%s5129_s0 + %s4366_s15]]   ;;  %s4370_s15 = smov 20  }
  0x17   :  { %s4512_s27 = sld [smem:[%s5129_s0 + %s4367_s22]]   ;;  %s4371_s22 = smov 21  }
  0x18   :  { %5146 = sst [smem:[#allocation63_spill]] %s4492_s30 }
  0x19   :  { %s4517_s4 = sld [smem:[%s5129_s0 + %s4368_s28]]   ;;  %s4372_s28 = smov 22  }
  0x1a   :  { %5147 = sst [smem:[#allocation64_spill]] %s4497_s6 }
  0x1b   :  { %s4522_s6 = sld [smem:[%s5129_s0 + %s4369_s7]]   ;;  %s4373_s7 = smov 23  }
  0x1c   :  { %s4527_s30 = sld [smem:[%s5129_s0 + %s4370_s15]]   ;;  %s4374_s15 = smov 24  }
  0x1d   :  { %5148 = sst [smem:[#allocation65_spill]] %s4512_s27 }
  0x1e   :  { %s4532_s25 = sld [smem:[%s5129_s0 + %s4371_s22]]   ;;  %s4375_s22 = smov 25  }
  0x1f   :  { %5149 = sst [smem:[#allocation66_spill]] %s4517_s4 }
  0x20   :  { %s4537_s21 = sld [smem:[%s5129_s0 + %s4372_s28]]   ;;  %s4376_s28 = smov 26  }
  0x21   :  { %5150 = sst [smem:[#allocation67_spill]] %s4522_s6 }
  0x22   :  { %s4542_s16 = sld [smem:[%s5129_s0 + %s4373_s7]]   ;;  %s4377_s7 = smov 27  }
  0x23   :  { %s4547_s23 = sld [smem:[%s5129_s0 + %s4374_s15]]  }
  0x24   :  { %5151 = sst [smem:[#allocation68_spill]] %s4532_s25 }
  0x25   :  { %s4552_s1 = sld [smem:[%s5129_s0 + %s4375_s22]]  }
  0x26   :  { %s4557_s10 = sld [smem:[%s5129_s0 + %s4376_s28]]  }
  0x27   :  { %s4562_s25 = sld [smem:[%s5129_s0 + %s4377_s7]]   ;;  %s4381_s7 = smov 31  }
  0x28   :  { %5152 = sst [smem:[#allocation69_spill]] %s4542_s16  ;;  %s71_s16 = sshll.u32 %s4432_s5, 4  ;;  %s72_s16 = int_to_ptr.vmem [resolvable:$true] %s71_s16 }
  0x29   :  { %s4567_s6 = sld [smem:[%s5129_s0 + %s4378_s17]]   ;;  %s4382_s17 = smov 32  }
  0x2a   :  { %s4577_s27 = sld [smem:[%s5129_s0 + %s4380_s9]]   ;;  %s3636_s22 = scalar_lea.vmem %s72_s16, 16 }
  0x2b   :  { %5153 = sst [smem:[#allocation70_spill]] %s4552_s1  ;;  %p3637_p0 = scmp.ne.s32.totalorder %s72_s16, %s3636_s22 }
  0x2c   :  { %s4572_s1 = sld [smem:[%s5129_s0 + %s4379_s13]]   ;;  %p3641_p1 = scmp.lt.s32.totalorder %s72_s16, %s72_s16 }
  0x2d   :  { %5154 = sst [smem:[#allocation71_spill]] %s4562_s25  ;;  %p3642_p2 = scmp.lt.s32.totalorder %s3636_s22, %s3636_s22 }
  0x2e   :  { %s4583_s15 = sld [smem:[%s5129_s0 + %s4381_s7]]  }
  0x2f   :  { %5155 = sst [smem:[#allocation72_spill]] %s4567_s6  ;;  %p3643_p3 = por %p3642_p2, %p3641_p1 }
  0x30   :  { %s4588_s13 = sld [smem:[%s5129_s0 + %s4382_s17]]  }
  0x31   :  { %p3644_p4 = pnand %p3643_p3, %p3637_p0 }
  0x33   :  { %3647 = shalt.err (!%p3644_p4)  }
  0x34   :  { %s4383_s5 = smov [#allocation5]   ;;  %s4384_s26 = smov 1  }
  0x35   :  { %74 = dma.vmem_to_smem %s72_s16, 16, %s4383_s5, [#allocation4] }
  0x36   :  { %s2948_s28 = sld [smem:[%s5129_s0 + %s4384_s26]]  }
  0x3c   :  { %s75_s2 = sshll.u32 %s2948_s28, 4  ;;  %s76_s2 = int_to_ptr.vmem [resolvable:$true] %s75_s2 }
  0x3d   :  { %s3648_s7 = scalar_lea.vmem %s76_s2, 16  ;;  %p3653_p6 = scmp.lt.s32.totalorder %s76_s2, %s76_s2 }
  0x3e   :  { %p3649_p5 = scmp.ne.s32.totalorder %s76_s2, %s3648_s7  ;;  %p3654_p7 = scmp.lt.s32.totalorder %s3648_s7, %s3648_s7 }
  0x40   :  { %p3655_p8 = por %p3654_p7, %p3653_p6 }
  0x42   :  { %p3656_p9 = pnand %p3655_p8, %p3649_p5 }
  0x44   :  { %3659 = shalt.err (!%p3656_p9)  }
  0x45   :  { %s4385_s6 = smov [#allocation6]  }
  0x46   :  { %78 = dma.vmem_to_smem %s76_s2, 16, %s4385_s6, [#allocation4] }
  0x47   :  { %4274 = dma.done.wait [#allocation4], 32 }
  0x48   :  { %4275 = vsyncadd [#allocation4], 4294967264 }
  0x49   :  { %80 = sfence }
  0x4a   :  { %81 = vsyncpa [#allocation8], 0 }
  0x4b   :  { %82 = vsyncpa [#allocation11], 0 }
  0x4c   :  { %83 = vsyncpa [#allocation14], 0 }
  0x4d   :  { %84 = vsyncpa [#allocation17], 0 }
  0x4e   :  { %85 = vsyncpa [#allocation20], 0 }
  0x4f   :  { %86 = vsyncpa [#allocation23], 0 }
  0x50   :  { %87 = vsyncpa [#allocation26], 0 }
  0x51   :  { %88 = vsyncpa [#allocation29], 0 }
  0x52   :  { %89 = vsyncpa [#allocation32], 0 }
  0x53   :  { %90 = vsyncpa [#allocation35], 0 }
  0x54   :  { %91 = vsyncpa [#allocation9], 0 }
  0x55   :  { %92 = vsyncpa [#allocation39], 0 }
  0x56   :  { %93 = vsyncpa [#allocation42], 0  ;;  %s4593_s0 = smov 0  }
  0x57 LB: > { %s4386_s16 = smov [#allocation10]   ;;  %s4599_s17 = sadd.s32 4294967295, %s4330_s0   ;;  %s4330_s0 = sphi %s4593_s0, %s99_s0  }
  0x58   : > { %s800_s11 = sshll.u32 %s4386_s16, 4  ;;  %p2981_p10 = scmp.ge.s32.totalorder %s4330_s0, 1  ;;  %s801_s11 = int_to_ptr.vmem [resolvable:$true] %s800_s11 }
  0x59   : > { %p770_p11 = scmp.lt.s32.totalorder %s4330_s0, 4  ;;  %p5134_p13 = scmp.eq.s32.totalorder %s4599_s17, 0 }
  0x5a   : > { %s4387_s22 = smov [#allocation13]   ;;  %s4388_s25 = smov [#allocation16]  }
  0x5b   : > { %p4605_p0 = pnand %p2981_p10, %p770_p11  ;;  %s823_s5 = sshll.u32 %s4387_s22, 4  ;;  %s4611_s5 = int_to_ptr.vmem [resolvable:$true] %s823_s5 }
  0x5c   : > { %s848_s9 = sshll.u32 %s4388_s25, 4  ;;  %s4389_s28 = smov [#allocation19]   ;;  %s4619_s9 = int_to_ptr.vmem [resolvable:$true] %s848_s9 }
  0x5d   : > { %s5156_s18 = scalar_select %p4605_p0, 1, 0 }
  0x5e   : > { %p3384_p1 = pneg %p4605_p0  ;;  %s4621_s2 = sshll.u32 %s4389_s28, 4  ;;  %s879_s2 = int_to_ptr.vmem [resolvable:$true] %s4621_s2 }
  0x5f   : > { %s3671_s6 = scalar_lea.vmem %s801_s11, 16  ;;  %s3678_s16 = scalar_lea.vmem %s801_s11, 32 }
  0x60   : > { %p4615_p2 = pnand %p5134_p13, %p3384_p1  ;;  %p3672_p4 = scmp.ne.s32.totalorder %s801_s11, %s3671_s6 }
  0x61   : > { %p3679_p7 = scmp.lt.s32.totalorder %s801_s11, %s801_s11  ;;  %p3680_p8 = scmp.lt.s32.totalorder %s3678_s16, %s3671_s6 }
  0x62   : > { %p4625_p3 = pneg %p4615_p2 }
  0x63   : > { %p3681_p9 = por %p3680_p8, %p3679_p7 }
  0x64   : > { %p3674_p5 = pnand %p3672_p4, %p4625_p3 }
  0x66   : > { %p3675_p6 = pneg %p3674_p5 }
  0x68   : > { %p3682_p10 = pnand %p3681_p9, %p3675_p6 }
  0x6a   : > { %3685 = shalt.err (!%p3682_p10)
}
  0x6b   : > { %s5159_s3 = sld [smem:[#allocation62_spill]]  ;;  %s3697_s22 = scalar_lea.vmem %s4611_s5, 512 }
  0x6c   : > { %p3698_p11 = scmp.ne.s32.totalorder %s4611_s5, %s3697_s22  ;;  %p3705_p5 = scmp.lt.s32.totalorder %s4611_s5, %s4611_s5 }
  0x6d   : > { %p3706_p12 = scmp.lt.s32.totalorder %s3697_s22, %s3697_s22 }
  0x6e   : > { %p3700_p1 = pnand %p3698_p11, %p4625_p3 }
  0x6f   : > { %p3707_p13 = por %p3706_p12, %p3705_p5 }
  0x70   : > { %p3701_p4 = pneg %p3700_p1 }
  0x71   : > { %3390 = dma.hbm_to_vmem [thread:$0]  (!%p4615_p2), %s5159_s3, 16, %s801_s11, [#allocation11]  }
  0x72   : > { %p3708_p7 = pnand %p3707_p13, %p3701_p4 }
  0x74   : > { %3711 = shalt.err (!%p3708_p7)
}
  0x75   : > { %s5135_s25 = smov 128   ;;  %s5138_s11 = smov 8  }
  0x76   : > { %3396 = dma.hbm_to_vmem [thread:$0]  (!%p4615_p2), %s4477_s14, 512, %s4611_s5, [#allocation14], %s5135_s25, %s5135_s25, %s5138_s11  }
  0x77   : > { %s3723_s28 = scalar_lea.vmem %s4619_s9, 16  ;;  %s3730_s6 = scalar_lea.vmem %s4619_s9, 32 }
  0x78   : > { %p3724_p6 = scmp.ne.s32.totalorder %s4619_s9, %s3723_s28  ;;  %p3731_p8 = scmp.lt.s32.totalorder %s4619_s9, %s4619_s9 }
  0x79   : > { %p3732_p9 = scmp.lt.s32.totalorder %s3730_s6, %s3723_s28 }
  0x7a   : > { %p3726_p12 = pnand %p3724_p6, %p4625_p3 }
  0x7b   : > { %p3733_p10 = por %p3732_p9, %p3731_p8 }
  0x7c   : > { %p3727_p13 = pneg %p3726_p12 }
  0x7e   : > { %p3734_p11 = pnand %p3733_p10, %p3727_p13 }
  0x80   : > { %3737 = shalt.err (!%p3734_p11)
}
  0x81   : > { %3402 = dma.hbm_to_vmem [thread:$0]  (!%p4615_p2), %s4487_s24, 16, %s4619_s9, [#allocation17]  }
  0x82   : > { %s3749_s5 = scalar_lea.vmem %s879_s2, 16  ;;  %s3756_s16 = scalar_lea.vmem %s879_s2, 32 }
  0x83   : > { %p3750_p1 = scmp.ne.s32.totalorder %s879_s2, %s3749_s5  ;;  %p3757_p7 = scmp.lt.s32.totalorder %s879_s2, %s879_s2 }
  0x84   : > { %p3758_p6 = scmp.lt.s32.totalorder %s3756_s16, %s3749_s5 }
  0x85   : > { %p3752_p4 = pnand %p3750_p1, %p4625_p3 }
  0x86   : > { %p3759_p12 = por %p3758_p6, %p3757_p7 }
  0x87   : > { %p3753_p5 = pneg %p3752_p4 }
  0x89   : > { %p3760_p8 = pnand %p3759_p12, %p3753_p5 }
  0x8b   : > { %3763 = shalt.err (!%p3760_p8)
}
  0x8c   : > { %3408 = dma.hbm_to_vmem [thread:$0]  (!%p4615_p2), %s4507_s20, 16, %s879_s2, [#allocation20]  }
  0x8d   : > { %s4392_s22 = smov [#allocation22]   ;;  %s4393_s9 = smov [#allocation25]  }
  0x8e   : > { %s899_s28 = sshll.u32 %s4392_s22, 4  ;;  %s925_s6 = sshll.u32 %s4393_s9, 4  ;;  %s900_s28 = int_to_ptr.vmem [resolvable:$true] %s899_s28  ;;  %s926_s6 = int_to_ptr.vmem [resolvable:$true] %s925_s6 }
  0x8f   : > { %s3775_s25 = scalar_lea.vmem %s900_s28, 512  ;;  %p3783_p11 = scmp.lt.s32.totalorder %s900_s28, %s900_s28 }
  0x90   : > { %p3776_p13 = scmp.ne.s32.totalorder %s900_s28, %s3775_s25  ;;  %p3784_p1 = scmp.lt.s32.totalorder %s3775_s25, %s3775_s25 }
  0x92   : > { %p3778_p9 = pnand %p3776_p13, %p4625_p3  ;;  %p3785_p4 = por %p3784_p1, %p3783_p11 }
  0x94   : > { %p3779_p10 = pneg %p3778_p9 }
  0x96   : > { %p3786_p5 = pnand %p3785_p4, %p3779_p10 }
  0x98   : > { %3789 = shalt.err (!%p3786_p5)
}
  0x99   : > { %s5160_s5 = smov 128   ;;  %s5161_s4 = sld [smem:[#allocation66_spill]] }
  0x9a   : > { %s3801_s2 = scalar_lea.vmem %s926_s6, 512  ;;  %p3809_p8 = scmp.lt.s32.totalorder %s926_s6, %s926_s6 }
  0x9b   : > { %p3802_p7 = scmp.ne.s32.totalorder %s926_s6, %s3801_s2  ;;  %p3810_p13 = scmp.lt.s32.totalorder %s3801_s2, %s3801_s2 }
  0x9d   : > { %p3804_p6 = pnand %p3802_p7, %p4625_p3  ;;  %p3811_p9 = por %p3810_p13, %p3809_p8 }
  0x9f   : > { %3414 = dma.hbm_to_vmem [thread:$0]  (!%p4615_p2), %s5161_s4, 512, %s900_s28, [#allocation23], %s5160_s5, %s5160_s5, %s5138_s11  }
  0xa0   : > { %p3805_p12 = pneg %p3804_p6 }
  0xa2   : > { %p3812_p11 = pnand %p3811_p9, %p3805_p12 }
  0xa4   : > { %3815 = shalt.err (!%p3812_p11)
}
  0xa5   : > { %3420 = dma.hbm_to_vmem [thread:$0]  (!%p4615_p2), %s4527_s30, 512, %s926_s6, [#allocation26], %s5160_s5, %s5160_s5, %s5138_s11  }
  0xa6   : > { %s4394_s25 = smov [#allocation28]   ;;  %s4395_s22 = smov [#allocation31]  }
  0xa7   : > { %s950_s16 = sshll.u32 %s4394_s25, 4  ;;  %s971_s28 = sshll.u32 %s4395_s22, 4  ;;  %s951_s16 = int_to_ptr.vmem [resolvable:$true] %s950_s16  ;;  %s972_s28 = int_to_ptr.vmem [resolvable:$true] %s971_s28 }
  0xa8   : > { %s3827_s9 = scalar_lea.vmem %s951_s16, 16  ;;  %s3834_s2 = scalar_lea.vmem %s951_s16, 32 }
  0xa9   : > { %p3828_p10 = scmp.ne.s32.totalorder %s951_s16, %s3827_s9  ;;  %p3835_p5 = scmp.lt.s32.totalorder %s951_s16, %s951_s16 }
  0xaa   : > { %p3836_p7 = scmp.lt.s32.totalorder %s3834_s2, %s3827_s9 }
  0xab   : > { %p3830_p1 = pnand %p3828_p10, %p4625_p3 }
  0xac   : > { %p3837_p6 = por %p3836_p7, %p3835_p5 }
  0xad   : > { %p3831_p4 = pneg %p3830_p1 }
  0xaf   : > { %p3838_p12 = pnand %p3837_p6, %p3831_p4 }
  0xb1   : > { %3841 = shalt.err (!%p3838_p12)
}
  0xb2   : > { %3426 = dma.hbm_to_vmem [thread:$0]  (!%p4615_p2), %s4537_s21, 16, %s951_s16, [#allocation29]  }
  0xb3   : > { %s3853_s6 = scalar_lea.vmem %s972_s28, 512  ;;  %p3861_p11 = scmp.lt.s32.totalorder %s972_s28, %s972_s28 }
  0xb4   : > { %p3854_p8 = scmp.ne.s32.totalorder %s972_s28, %s3853_s6  ;;  %p3862_p10 = scmp.lt.s32.totalorder %s3853_s6, %s3853_s6 }
  0xb6   : > { %p3856_p13 = pnand %p3854_p8, %p4625_p3  ;;  %p3863_p1 = por %p3862_p10, %p3861_p11 }
  0xb8   : > { %p3857_p9 = pneg %p3856_p13 }
  0xba   : > { %p3864_p0 = pnand %p3863_p1, %p3857_p9 }
  0xbc   : > { %3867 = shalt.err (!%p3864_p0)
}
  0xbd   : > { %3432 = dma.hbm_to_vmem [thread:$0]  (!%p4615_p2), %s4547_s23, 512, %s972_s28, [#allocation32], %s5160_s5, %s5160_s5, %s5138_s11  }
  0xbe   : > { %s4396_s25 = smov [#allocation34]   ;;  %s4397_s22 = smov [#allocation7]  }
  0xbf   : > { %s998_s16 = sshll.u32 %s4396_s25, 4  ;;  %s789_s9 = sshll.u32 %s4397_s22, 4  ;;  %s999_s16 = int_to_ptr.vmem [resolvable:$true] %s998_s16  ;;  %s790_s9 = int_to_ptr.vmem [resolvable:$true] %s789_s9 }
  0xc0   : > { %s3879_s2 = scalar_lea.vmem %s999_s16, 16  ;;  %s3886_s6 = scalar_lea.vmem %s999_s16, 32 }
  0xc1   : > { %p3880_p4 = scmp.ne.s32.totalorder %s999_s16, %s3879_s2  ;;  %p3887_p0 = scmp.lt.s32.totalorder %s999_s16, %s999_s16 }
  0xc2   : > { %p3888_p6 = scmp.lt.s32.totalorder %s3886_s6, %s3879_s2 }
  0xc3   : > { %p3882_p5 = pnand %p3880_p4, %p4625_p3 }
  0xc4   : > { %p3889_p12 = por %p3888_p6, %p3887_p0 }
  0xc5   : > { %p3883_p7 = pneg %p3882_p5 }
  0xc7   : > { %p3890_p8 = pnand %p3889_p12, %p3883_p7 }
  0xc9   : > { %3893 = shalt.err (!%p3890_p8)
}
  0xca   : > { %3438 = dma.hbm_to_vmem [thread:$0]  (!%p4615_p2), %s4557_s10, 16, %s999_s16, [#allocation35]  }
  0xcb   : > { %s3905_s28 = scalar_lea.vmem %s790_s9, 16  ;;  %s3912_s25 = scalar_lea.vmem %s790_s9, 32 }
  0xcc   : > { %p3906_p13 = scmp.ne.s32.totalorder %s790_s9, %s3905_s28  ;;  %p3913_p10 = scmp.lt.s32.totalorder %s790_s9, %s790_s9 }
  0xcd   : > { %p3914_p1 = scmp.lt.s32.totalorder %s3912_s25, %s3905_s28 }
  0xce   : > { %p3908_p9 = pnand %p3906_p13, %p4625_p3 }
  0xcf   : > { %p3915_p4 = por %p3914_p1, %p3913_p10 }
  0xd0   : > { %p3909_p11 = pneg %p3908_p9 }
  0xd2   : > { %p3916_p5 = pnand %p3915_p4, %p3909_p11 }
  0xd4   : > { %3919 = shalt.err (!%p3916_p5)
}
  0xd5   : > { %3387 = dma.hbm_to_vmem [thread:$0]  (!%p4615_p2), %s4462_s29, 16, %s790_s9, [#allocation8]  }
  0xd6   : > { %s4398_s22 = smov [#allocation12]   ;;  %s4399_s16 = smov [#allocation15]  }
  0xd7   : > { %s810_s2 = sshll.u32 %s4398_s22, 4  ;;  %s837_s6 = sshll.u32 %s4399_s16, 4  ;;  %s811_s2 = int_to_ptr.vmem [resolvable:$true] %s810_s2  ;;  %s838_s6 = int_to_ptr.vmem [resolvable:$true] %s837_s6 }
  0xd8   : > { %s3931_s11 = scalar_lea.vmem %s811_s2, 512  ;;  %p3939_p12 = scmp.lt.s32.totalorder %s811_s2, %s811_s2 }
  0xd9   : > { %p3932_p7 = scmp.ne.s32.totalorder %s811_s2, %s3931_s11  ;;  %p3940_p8 = scmp.lt.s32.totalorder %s3931_s11, %s3931_s11 }
  0xdb   : > { %p3934_p0 = pnand %p3932_p7, %p4625_p3  ;;  %p3941_p13 = por %p3940_p8, %p3939_p12 }
  0xdd   : > { %p3935_p6 = pneg %p3934_p0 }
  0xdf   : > { %p3942_p9 = pnand %p3941_p13, %p3935_p6 }
  0xe1   : > { %3945 = shalt.err (!%p3942_p9)
}
  0xe2   : > { %s5162_s28 = smov 8   ;;  %s3957_s9 = scalar_lea.vmem %s838_s6, 16 }
  0xe3   : > { %3393 = dma.hbm_to_vmem [thread:$0]  (!%p4615_p2), %s4472_s8, 512, %s811_s2, [#allocation11], %s5160_s5, %s5160_s5, %s5162_s28  }
  0xe4   : > { %p3958_p11 = scmp.ne.s32.totalorder %s838_s6, %s3957_s9  ;;  %s3964_s25 = scalar_lea.vmem %s838_s6, 32 }
  0xe5   : > { %p3965_p4 = scmp.lt.s32.totalorder %s838_s6, %s838_s6  ;;  %p3966_p5 = scmp.lt.s32.totalorder %s3964_s25, %s3957_s9 }
  0xe6   : > { %p3960_p10 = pnand %p3958_p11, %p4625_p3 }
  0xe7   : > { %p3967_p7 = por %p3966_p5, %p3965_p4 }
  0xe8   : > { %p3961_p1 = pneg %p3960_p10 }
  0xea   : > { %p3968_p0 = pnand %p3967_p7, %p3961_p1 }
  0xec   : > { %3971 = shalt.err (!%p3968_p0)
}
  0xed   : > { %3399 = dma.hbm_to_vmem [thread:$0]  (!%p4615_p2), %s4482_s19, 16, %s838_s6, [#allocation14]  }
  0xee   : > { %s4400_s11 = smov [#allocation18]   ;;  %s4401_s2 = smov [#allocation21]  }
  0xef   : > { %s864_s22 = sshll.u32 %s4400_s11, 4  ;;  %s889_s16 = sshll.u32 %s4401_s2, 4  ;;  %s865_s22 = int_to_ptr.vmem [resolvable:$true] %s864_s22  ;;  %s890_s16 = int_to_ptr.vmem [resolvable:$true] %s889_s16 }
  0xf0   : > { %s3983_s3 = scalar_lea.vmem %s865_s22, 512  ;;  %p3991_p13 = scmp.lt.s32.totalorder %s865_s22, %s865_s22 }
  0xf1   : > { %p3984_p6 = scmp.ne.s32.totalorder %s865_s22, %s3983_s3  ;;  %p3992_p9 = scmp.lt.s32.totalorder %s3983_s3, %s3983_s3 }
  0xf3   : > { %p3986_p12 = pnand %p3984_p6, %p4625_p3  ;;  %p3993_p11 = por %p3992_p9, %p3991_p13 }
  0xf5   : > { %p3987_p8 = pneg %p3986_p12 }
  0xf7   : > { %p3994_p10 = pnand %p3993_p11, %p3987_p8 }
  0xf9   : > { %3997 = shalt.err (!%p3994_p10)
}
  0xfa   : > { %3405 = dma.hbm_to_vmem [thread:$0]  (!%p4615_p2), %s4502_s12, 512, %s865_s22, [#allocation17], %s5160_s5, %s5160_s5, %s5162_s28  }
  0xfb   : > { %s4009_s6 = scalar_lea.vmem %s890_s16, 16  ;;  %s4016_s9 = scalar_lea.vmem %s890_s16, 32 }
  0xfc   : > { %p4010_p1 = scmp.ne.s32.totalorder %s890_s16, %s4009_s6  ;;  %p4017_p7 = scmp.lt.s32.totalorder %s890_s16, %s890_s16 }
  0xfd   : > { %p4018_p0 = scmp.lt.s32.totalorder %s4016_s9, %s4009_s6 }
  0xfe   : > { %p4012_p4 = pnand %p4010_p1, %p4625_p3 }
  0xff   : > { %p4019_p6 = por %p4018_p0, %p4017_p7 }
 0x100   : > { %p4013_p5 = pneg %p4012_p4 }
 0x102   : > { %p4020_p12 = pnand %p4019_p6, %p4013_p5 }
 0x104   : > { %4023 = shalt.err (!%p4020_p12)
}
 0x105   : > { %s5163_s3 = sld [smem:[#allocation65_spill]]  ;;  %s4402_s25 = smov [#allocation24]  }
 0x106   : > { %s912_s11 = sshll.u32 %s4402_s25, 4  ;;  %s4403_s22 = smov [#allocation27]   ;;  %s913_s11 = int_to_ptr.vmem [resolvable:$true] %s912_s11 }
 0x107   : > { %s939_s2 = sshll.u32 %s4403_s22, 4  ;;  %s4035_s4 = scalar_lea.vmem %s913_s11, 512  ;;  %s940_s2 = int_to_ptr.vmem [resolvable:$true] %s939_s2 }
 0x108   : > { %p4036_p8 = scmp.ne.s32.totalorder %s913_s11, %s4035_s4  ;;  %p4043_p11 = scmp.lt.s32.totalorder %s913_s11, %s913_s11 }
 0x109   : > { %p4044_p10 = scmp.lt.s32.totalorder %s4035_s4, %s4035_s4 }
 0x10a   : > { %p4038_p13 = pnand %p4036_p8, %p4625_p3 }
 0x10b   : > { %3411 = dma.hbm_to_vmem [thread:$0]  (!%p4615_p2), %s5163_s3, 16, %s890_s16, [#allocation20]  }
 0x10c   : > { %p4039_p9 = pneg %p4038_p13  ;;  %p4045_p1 = por %p4044_p10, %p4043_p11 }
 0x10e   : > { %p4046_p4 = pnand %p4045_p1, %p4039_p9 }
 0x110   : > { %4049 = shalt.err (!%p4046_p4)
}
 0x111   : > { %s5164_s16 = sld [smem:[#allocation67_spill]]  ;;  %s4061_s6 = scalar_lea.vmem %s940_s2, 16 }
 0x112   : > { %p4062_p5 = scmp.ne.s32.totalorder %s940_s2, %s4061_s6  ;;  %s4068_s9 = scalar_lea.vmem %s940_s2, 32 }
 0x113   : > { %p4069_p6 = scmp.lt.s32.totalorder %s940_s2, %s940_s2  ;;  %p4070_p12 = scmp.lt.s32.totalorder %s4068_s9, %s4061_s6 }
 0x114   : > { %p4064_p7 = pnand %p4062_p5, %p4625_p3 }
 0x115   : > { %p4071_p8 = por %p4070_p12, %p4069_p6 }
 0x116   : > { %p4065_p0 = pneg %p4064_p7 }
 0x117   : > { %3417 = dma.hbm_to_vmem [thread:$0]  (!%p4615_p2), %s5164_s16, 512, %s913_s11, [#allocation23], %s5160_s5, %s5160_s5, %s5162_s28  }
 0x118   : > { %p4072_p13 = pnand %p4071_p8, %p4065_p0 }
 0x11a   : > { %4075 = shalt.err (!%p4072_p13)
}
 0x11b   : > { %s5165_s4 = sld [smem:[#allocation68_spill]]  ;;  %s4404_s3 = smov [#allocation30]  }
 0x11c   : > { %s961_s25 = sshll.u32 %s4404_s3, 4  ;;  %s4405_s11 = smov [#allocation33]   ;;  %s962_s25 = int_to_ptr.vmem [resolvable:$true] %s961_s25 }
 0x11d   : > { %s984_s22 = sshll.u32 %s4405_s11, 4  ;;  %s4087_s16 = scalar_lea.vmem %s962_s25, 64  ;;  %s985_s22 = int_to_ptr.vmem [resolvable:$true] %s984_s22 }
 0x11e   : > { %p4088_p9 = scmp.ne.s32.totalorder %s962_s25, %s4087_s16  ;;  %p4095_p1 = scmp.lt.s32.totalorder %s962_s25, %s962_s25 }
 0x11f   : > { %p4096_p4 = scmp.lt.s32.totalorder %s4087_s16, %s4087_s16 }
 0x120   : > { %p4090_p11 = pnand %p4088_p9, %p4625_p3 }
 0x121   : > { %3423 = dma.hbm_to_vmem [thread:$0]  (!%p4615_p2), %s5165_s4, 16, %s940_s2, [#allocation26]  }
 0x122   : > { %p4091_p10 = pneg %p4090_p11  ;;  %p4097_p5 = por %p4096_p4, %p4095_p1 }
 0x124   : > { %p4098_p7 = pnand %p4097_p5, %p4091_p10 }
 0x126   : > { %4101 = shalt.err (!%p4098_p7)
}
 0x127   : > { %s5166_s6 = sld [smem:[#allocation69_spill]]  ;;  %s4113_s2 = scalar_lea.vmem %s985_s22, 512 }
 0x128   : > { %p4114_p0 = scmp.ne.s32.totalorder %s985_s22, %s4113_s2  ;;  %p4121_p8 = scmp.lt.s32.totalorder %s985_s22, %s985_s22 }
 0x129   : > { %p4122_p13 = scmp.lt.s32.totalorder %s4113_s2, %s4113_s2 }
 0x12a   : > { %p4116_p6 = pnand %p4114_p0, %p4625_p3 }
 0x12b   : > { %p4123_p9 = por %p4122_p13, %p4121_p8 }
 0x12c   : > { %p4117_p12 = pneg %p4116_p6 }
 0x12d   : > { %3429 = dma.hbm_to_vmem [thread:$0]  (!%p4615_p2), %s5166_s6, 64, %s962_s25, [#allocation29]  }
 0x12e   : > { %p4124_p11 = pnand %p4123_p9, %p4117_p12 }
 0x130   : > { %4127 = shalt.err (!%p4124_p11)
}
 0x131   : > { %s5167_s9 = sld [smem:[#allocation70_spill]]  ;;  %s4406_s4 = smov [#allocation36]  }
 0x132   : > { %s1012_s3 = sshll.u32 %s4406_s4, 4  ;;  %s1013_s3 = int_to_ptr.vmem [resolvable:$true] %s1012_s3 }
 0x133   : > { %s4139_s25 = scalar_lea.vmem %s1013_s3, 16  ;;  %s4146_s11 = scalar_lea.vmem %s1013_s3, 32 }
 0x134   : > { %p4140_p10 = scmp.ne.s32.totalorder %s1013_s3, %s4139_s25  ;;  %p4147_p5 = scmp.lt.s32.totalorder %s1013_s3, %s1013_s3 }
 0x135   : > { %p4148_p7 = scmp.lt.s32.totalorder %s4146_s11, %s4139_s25 }
 0x136   : > { %p4142_p1 = pnand %p4140_p10, %p4625_p3 }
 0x137   : > { %3435 = dma.hbm_to_vmem [thread:$0]  (!%p4615_p2), %s5167_s9, 512, %s985_s22, [#allocation32], %s5160_s5, %s5160_s5, %s5162_s28  }
 0x138   : > { %p4143_p4 = pneg %p4142_p1  ;;  %p4149_p0 = por %p4148_p7, %p4147_p5 }
 0x13a   : > { %p4150_p6 = pnand %p4149_p0, %p4143_p4 }
 0x13c   : > { %4153 = shalt.err (!%p4150_p6)
}
 0x13d   : > { %s5168_s16 = sld [smem:[#allocation72_spill]]  ;;  %p5169_p12 = scmp.ne.s32.totalorder %s5156_s18, 0 }
 0x13e   : > { %p5170_p8 = scmp.eq.s32.totalorder (!%p5169_p12), %s4599_s17, 0 }
 0x13f   : > { %1046 = sbr.rel (%p5169_p12) target bundleno = 2934 (0xb76), region = 128 }
 0x143   : > { %3441 = dma.hbm_to_vmem [thread:$0]  (!%p4615_p2), %s5168_s16, 16, %s1013_s3, [#allocation35]  }
 0x144   : > { %4277 = dma.done.wait (%p5170_p8), [#allocation8], 16   ;;  %p5171_p13 = pmov %p5170_p8 }
 0x145   : > { %p5172_p3 = pmov %p5170_p8 }
 0x146   : > { %4279 = vsyncadd (%p5171_p13), [#allocation8], 4294967280 }
 0x147   : > { %4281 = dma.done.wait (%p5172_p3), [#allocation11], 528   ;;  %p5173_p9 = pmov %p5172_p3 }
 0x148   : > { %p5174_p11 = pmov %p5172_p3 }
 0x149   : > { %4283 = vsyncadd (%p5173_p9), [#allocation11], 4294966768 }
 0x14a   : > { %4285 = dma.done.wait (%p5174_p11), [#allocation14], 528   ;;  %p5175_p2 = pmov %p5172_p3 }
 0x14c   : > { %4287 = vsyncadd (%p5175_p2), [#allocation14], 4294966768  ;;  %p5176_p10 = pmov %p5175_p2 }
 0x14d   : > { %p5177_p1 = pmov %p5175_p2 }
 0x14e   : > { %4289 = dma.done.wait (%p5176_p10), [#allocation17], 528  }
 0x14f   : > { %4291 = vsyncadd (%p5177_p1), [#allocation17], 4294966768  ;;  %p5178_p4 = pmov %p5177_p1 }
 0x150   : > { %p5179_p5 = pmov %p5177_p1 }
 0x151   : > { %4293 = dma.done.wait (%p5178_p4), [#allocation20], 32  }
 0x152   : > { %4295 = vsyncadd (%p5179_p5), [#allocation20], 4294967264  ;;  %p5180_p7 = pmov %p5177_p1 }
 0x153   : > { %p5181_p0 = pmov %p5177_p1 }
 0x154   : > { %4297 = dma.done.wait (%p5180_p7), [#allocation23], 1024  }
 0x155   : > { %4299 = vsyncadd (%p5181_p0), [#allocation23], 4294966272  ;;  %p5182_p6 = pmov %p5181_p0 }
 0x156   : > { %p5183_p12 = pmov %p5181_p0 }
 0x157   : > { %4301 = dma.done.wait (%p5182_p6), [#allocation26], 528  }
 0x158   : > { %4303 = vsyncadd (%p5183_p12), [#allocation26], 4294966768  ;;  %p5184_p8 = pmov %p5181_p0 }
 0x159   : > { %p5185_p13 = pmov %p5181_p0 }
 0x15a   : > { %4305 = dma.done.wait (%p5184_p8), [#allocation29], 80  }
 0x15b   : > { %4307 = vsyncadd (%p5185_p13), [#allocation29], 4294967216  ;;  %p5186_p3 = pmov %p5181_p0 }
 0x15c   : > { %p5187_p9 = pmov %p5181_p0 }
 0x15d   : > { %4309 = dma.done.wait (%p5186_p3), [#allocation32], 1024  }
 0x15e   : > { %4311 = vsyncadd (%p5187_p9), [#allocation32], 4294966272  ;;  %p5188_p11 = pmov %p5181_p0 }
 0x15f   : > { %p5189_p2 = pmov %p5181_p0 }
 0x160   : > { %4313 = dma.done.wait (%p5188_p11), [#allocation35], 32  }
 0x161   : > { %4315 = vsyncadd (%p5189_p2), [#allocation35], 4294967264  ;;  %s5190_s18 = sld [smem:[#allocation57_spill]]  ;;  %p1198_p10 = scmp.lt.s32.totalorder %s4599_s17, 2 }
 0x162   : > { %s5191_s26 = sld [smem:[#allocation58_spill]]  ;;  %p5193_p1 = scmp.ne.s32.totalorder %s4599_s17, 0 }
 0x163   : > { %s5192_s7 = sld [smem:[#allocation59_spill]] }
 0x164   : > { %s1199_s5 = scalar_select %p1198_p10, %s4599_s17, 2 }
 0x165   : > { %1213 = sbr.rel (%p5193_p1) target bundleno = 366 (0x16e), region = 208 }
 0x166   : > { %s4804_s28 = sshll.u32 %s1199_s5, 1 }
 0x167   : > { %s1201_s22 = scalar_lea.vmem %s5190_s18, %s4804_s28 }
 0x168   : > { %s1205_s6 = scalar_lea.vmem %s5191_s26, %s4804_s28 }
 0x169   : > { %s1209_s2 = scalar_lea.vmem %s5192_s7, %s4804_s28 }
 0x16a   : > { %vm1214_vm0 = vcmask 254976   ;;  %vm1217_vm1 = vcmask 0   ;;  %v4407_v0 = vmov 0.0  }
 0x16b   : > { %1215 = vst.msk [vmem:[#allocation2] sm:$0x3] %vm1214_vm0, %v4407_v0  ;;  %1216 = vst.msk [vmem:[#allocation3] sm:$0x3] %vm1214_vm0, %v4407_v0 }
 0x16c   : > { %1218 = vst.msk [vmem:[#allocation37] sm:$0x1] %vm1217_vm1, %v4407_v0  ;;  %1219 = vst.msk [vmem:[#allocation38] sm:$0x1] %vm1217_vm1, %v4407_v0 }
 0x16d   : > { %1220 = vst.msk [vmem:[#allocation40] sm:$0x1] %vm1217_vm1, %v4407_v0  ;;  %1221 = vst.msk [vmem:[#allocation41] sm:$0x1] %vm1217_vm1, %v4407_v0 }
 0x16e PF: > { %s5194_s9 = sld [smem:[#allocation60_spill]]  ;;  %v4841_v9 = vld [vmem:[#allocation7] ss:$0 sm:$0xff]  ;;  %v4843_v10 = vld [vmem:[#allocation10] ss:$0 sm:$0xff]  ;;  %v4845_v11 = vld [vmem:[#allocation12] sm:$0xff] }
 0x16f   : > { %s5195_s4 = sld [smem:[#allocation61_spill]]  ;;  %v4847_v12 = vld [vmem:[#allocation12 + $0x8] sm:$0xff]  ;;  %v4849_v13 = vld [vmem:[#allocation12 + $0x10] sm:$0xff]  ;;  %v4851_v14 = vld [vmem:[#allocation12 + $0x18] sm:$0xff] }
 0x170   : > { %s4824_s3 = sld [smem:[#allocation5 + %s4599_s17]]  ;;  %v4853_v15 = vld [vmem:[#allocation13] sm:$0xff]  ;;  %v4855_v16 = vld [vmem:[#allocation13 + $0x8] sm:$0xff]  ;;  %v4857_v17 = vld [vmem:[#allocation13 + $0x10] sm:$0xff] }
 0x171   : > { %v4859_v18 = vld [vmem:[#allocation13 + $0x18] sm:$0xff]  ;;  %v4861_v19 = vld [vmem:[#allocation15] ss:$0 sm:$0xff]  ;;  %v4863_v20 = vld [vmem:[#allocation16] ss:$0 sm:$0xff] }
 0x172   : > { %v1243_v21 = vld [vmem:[#allocation2] sm:$0x3]   ;;  %v1244_v22 = vld [vmem:[#allocation3] sm:$0x3]  }
 0x173   : > { %v5196_v23 = vmov %v1244_v22  ;;  %v5197_v24 = vmov %v1243_v21 }
 0x174   : > { %v4815_v1 = vld [vmem:[%s5194_s9] sm:$0xff]  ;;  %v4818_v2 = vld [vmem:[%s5194_s9 + $0x8] sm:$0xff]  ;;  %v4821_v3 = vld [vmem:[%s5194_s9 + $0x10] sm:$0xff] }
 0x175   : > { %v4827_v4 = vld [vmem:[%s5194_s9 + $0x18] sm:$0xff]  ;;  %v4830_v5 = vld [vmem:[%s5195_s4] sm:$0xff]  ;;  %v4833_v6 = vld [vmem:[%s5195_s4 + $0x8] sm:$0xff] }
 0x176   : > { %v4836_v7 = vld [vmem:[%s5195_s4 + $0x10] sm:$0xff]  ;;  %v4839_v8 = vld [vmem:[%s5195_s4 + $0x18] sm:$0xff]  ;;  %p3026_p4 = scmp.le.s32.totalorder %s4824_s3, 0 }
 0x177   : > { %s4874_s25 = smov (!%p3026_p4), 0  }
 0x178   : > { %2723 = sbr.rel (%p3026_p4) target bundleno = 1073 (0x431), region = 299 }
 0x17d LB: >> { %v4408_v25 = vmov 0.0   ;;  %vm4409_vm2 = vmmov 0   ;;  %vm1259_vm3 = vcmask 261120   ;;  %s4410_s11 = smov 32   ;;  %s4411_s16 = smov 96   ;;  %s4342_s25 = sphi %s4874_s25, %s1248_s25   ;;  %v4338_v21 = vphi %v1243_v21, %v5199_v21   ;;  %v4334_v22 = vphi %v1244_v22, %v5198_v22  }
 0x17e   : >> { %3134 = vmatprep.subr.mxu0 %v4408_v25  ;;  %3142 = vmatprep.mubr.msk.f32.mxu0 %vm4409_vm2, %v4408_v25  ;;  %s1248_s25 = sadd.s32 1, %s4342_s25  }
 0x17f   : >> { %3135 = vmatpush3.msra.mxu0 %v4827_v4  ;;  %3145 = vmatprep.subr.mxu1 %v4408_v25  ;;  %p1247_p5 = scmp.ge.s32.totalorder %s1248_s25, %s4824_s3 }
 0x180   : >> { %3136 = vmatprep.subr.mxu0 %v4408_v25  ;;  %3146 = vmatpush3.msra.mxu1 %v4839_v8 }
 0x181   : >> { %3137 = vmatpush3.msra.mxu0 %v4821_v3  ;;  %3147 = vmatprep.subr.mxu1 %v4408_v25 }
 0x182   : >> { %3138 = vmatprep.subr.mxu0 %v4408_v25  ;;  %3148 = vmatpush3.msra.mxu1 %v4836_v7 }
 0x183   : >> { %3139 = vmatpush3.msra.mxu0 %v4818_v2  ;;  %3149 = vmatprep.subr.mxu1 %v4408_v25 }
 0x184   : >> { %3140 = vmatprep.subr.mxu0 %v4408_v25  ;;  %3150 = vmatpush3.msra.mxu1 %v4833_v6 }
 0x185   : >> { %3141 = vmatpush3.msra.mxu0 %v4815_v1  ;;  %3151 = vmatprep.subr.mxu1 %v4408_v25 }
 0x186   : >> { %3143 = vmatmul.mubr.msk.f32.vlgmr.msra.gmra.mxu0 %vm1259_vm3, %v4338_v21  ;;  %3156 = vmatprep.subr.mxu0 %v4408_v25 }
 0x187   : >> { %3157 = vmatpush3.msra.mxu0 %v4851_v14  ;;  %3164 = vmatprep.mubr.msk.f32.mxu0 %vm4409_vm2, %v4408_v25 }
 0x188   : >> { %3158 = vmatprep.subr.mxu0 %v4408_v25  ;;  %3152 = vmatpush3.msra.mxu1 %v4830_v5 }
 0x189   : >> { %3159 = vmatpush3.msra.mxu0 %v4849_v13  ;;  %3153 = vmatprep.mubr.msk.f32.mxu1 %vm4409_vm2, %v4408_v25 }
 0x18a   : >> { %3160 = vmatprep.subr.mxu0 %v4408_v25  ;;  %3167 = vmatprep.subr.mxu1 %v4408_v25 }
 0x18b   : >> { %3161 = vmatpush3.msra.mxu0 %v4847_v12 }
 0x18c   : >> { %3162 = vmatprep.subr.mxu0 %v4408_v25 }
 0x18d   : >> { %3163 = vmatpush3.msra.mxu0 %v4845_v11 }
 0x18e   : >> { %3165 = vmatmul.mubr.msk.f32.vlgmr.msra.gmra.mxu0 %vm1259_vm3, %v4334_v22 }
 0x246   : >> { %v1329_v26 = vpop.f32.mrf.mxu0 }
 0x247   : >> { %v1330_v27 = vadd.f32 %v4841_v9, %v1329_v26 }
 0x248   : >> { %v3144_v28 = vpop.f32.mrf.mxu0 }
 0x249   : >> { %v3029_v29 = vmul.f32 -1.442695, %v1330_v27 }
 0x24b   : >> { %3608 = vpow2.f32 %v3029_v29 }
 0x24e   : >> { %v1508_v30 = vpop.f32.mrf.mxu0 }
 0x24f   : >> { %v1509_v31 = vadd.f32 %v4861_v19, %v1508_v30 }
 0x250   : >> { %v3166_v32 = vpop.f32.mrf.mxu0 }
 0x251   : >> { %v3034_v33 = vmul.f32 -1.442695, %v1509_v31 }
 0x253   : >> { %3610 = vpow2.f32 %v3034_v33 }
 0x258   : >> { %v3609_v34 = vpop.eup %3608 }
 0x259   : >> { %v1336_v35 = vadd.f32 1.0, %v3609_v34 }
 0x25b   : >> { %3612 = vrcp.f32 %v1336_v35 }
 0x260   : >> { %v3611_v36 = vpop.eup %3610 }
 0x261   : >> { %v1515_v37 = vadd.f32 1.0, %v3611_v36 }
 0x263   : >> { %3614 = vrcp.f32 %v1515_v37 }
 0x268   : >> { %v3613_v38 = vpop.eup %3612 }
 0x269   : >> { %v1339_v39 = vmul.f32 %v4338_v21, %v3613_v38  ;;  %v1420_v52 = vsub.f32 1.0, %v3613_v38 }
 0x26b   : >> { %3154 = vmatmul.mubr.msk.f32.vlgmr.msra.gmra.mxu1 %vm1259_vm3, %v1339_v39  ;;  %v1421_v53 = vmul.f32 0.1, %v1420_v52 }
 0x26c   : >> { %3168 = vmatpush3.msra.mxu1 %v4859_v18  ;;  %3175 = vmatprep.mubr.msk.f32.mxu1 %vm4409_vm2, %v4408_v25 }
 0x26d   : >> { %3169 = vmatprep.subr.mxu1 %v4408_v25 }
 0x26e   : >> { %3170 = vmatpush3.msra.mxu1 %v4857_v17 }
 0x26f   : >> { %3171 = vmatprep.subr.mxu1 %v4408_v25 }
 0x270   : >> { %v3615_v40 = vpop.eup %3614  ;;  %3172 = vmatpush3.msra.mxu1 %v4855_v16 }
 0x271   : >> { %3173 = vmatprep.subr.mxu1 %v4408_v25  ;;  %v1518_v41 = vmul.f32 %v4334_v22, %v3615_v40  ;;  %v1599_v56 = vsub.f32 1.0, %v3615_v40 }
 0x272   : >> { %3174 = vmatpush3.msra.mxu1 %v4853_v15 }
 0x273   : >> { %3176 = vmatmul.mubr.msk.f32.vlgmr.msra.gmra.mxu1 %vm1259_vm3, %v1518_v41  ;;  %v1600_v57 = vmul.f32 0.1, %v1599_v56 }
 0x32b   : >> { %v1415_v42 = vpop.f32.mrf.mxu1 }
 0x32c   : >> { %v1416_v43 = vadd.f32 %v4843_v10, %v1415_v42 }
 0x32d   : >> { %v3155_v44 = vpop.f32.mrf.mxu1 }
 0x32e   : >> { %3616 = vtanh.f32 %v1416_v43 }
 0x333   : >> { %v1594_v45 = vpop.f32.mrf.mxu1 }
 0x334   : >> { %v1595_v46 = vadd.f32 %v4863_v20, %v1594_v45 }
 0x335   : >> { %v3177_v47 = vpop.f32.mrf.mxu1 }
 0x336   : >> { %3618 = vtanh.f32 %v1595_v46 }
 0x33b   : >> { %v3617_v48 = vpop.eup %3616 }
 0x33c   : >> { %v1422_v49 = vsub.f32 %v3617_v48, %v4338_v21 }
 0x33e   : >> { %1424 = vrot.lane.b32.xlu0 %v1422_v49, %s4410_s11 }
 0x343   : >> { %v3619_v50 = vpop.eup %3618 }
 0x344   : >> { %v1601_v51 = vsub.f32 %v3619_v50, %v4334_v22 }
 0x346   : >> { %1603 = vrot.lane.b32.xlu0 %v1601_v51, %s4410_s11 }
 0x3b0   : >> { %v1425_v54 = vpop.permute.xlu0 %1424 }
 0x3b1   : >> { %v1427_v55 = vmul.f32 %v1425_v54, %v1421_v53 }
 0x3b3   : >> { %1429 = vrot.lane.b32.xlu1 %v1427_v55, %s4411_s16 }
 0x3b8   : >> { %v1604_v58 = vpop.permute.xlu0 %1603 }
 0x3b9   : >> { %v1606_v59 = vmul.f32 %v1604_v58, %v1600_v57 }
 0x3bb   : >> { %1608 = vrot.lane.b32.xlu1 %v1606_v59, %s4411_s16 }
 0x425   : >> { %v1430_v60 = vpop.permute.xlu1 %1429 }
 0x426   : >> { %v1432_v61 = vadd.f32 %v4338_v21, %v1430_v60  }
 0x428   : >> { %v5199_v21 = vmov %v1432_v61  ;;  %v5201_v24 = vmov (%p1247_p5), %v1432_v61 }
 0x42c   : > { %1250 = sbr.rel (!%p1247_p5) target bundleno = 381 (0x17d), region = 305 }
 0x42d   : >> { %v1609_v62 = vpop.permute.xlu1 %1608 }
 0x42e   : >> { %v1611_v63 = vadd.f32 %v4334_v22, %v1609_v62  }
 0x430   : >> { %v5198_v22 = vmov %v1611_v63  ;;  %v5200_v23 = vmov (%p1247_p5), %v1611_v63 }
 0x431 PF: > { %v1619_v0 = vld [vmem:[#allocation33 + $0x18] sm:$0xff]  ;;  %v4412_v25 = vmov 0.0   ;;  %v1618_v26 = vld [vmem:[#allocation33 + $0x10] sm:$0xff]  ;;  %v1617_v2 = vld [vmem:[#allocation33 + $0x8] sm:$0xff]  ;;  %s5202_s18 = sld [smem:[#allocation63_spill]]  ;;  %vm1620_vm4 = vcmask 261120   ;;  %v4350_v24 = vphi %v5197_v24, %v5201_v24   ;;  %v4346_v23 = vphi %v5196_v23, %v5200_v23  }
 0x432   : > { %v1615_v21 = vld [vmem:[#allocation31 + $0x18] sm:$0xff]  ;;  %3178 = vmatprep.subr.mxu0 %v4412_v25  ;;  %3189 = vmatprep.subr.mxu1 %v4412_v25  ;;  %v1614_v1 = vld [vmem:[#allocation31 + $0x10] sm:$0xff]  ;;  %v1613_v3 = vld [vmem:[#allocation31 + $0x8] sm:$0xff]  ;;  %s5204_s7 = sld [smem:[#allocation71_spill]]  ;;  %vm4413_vm5 = vmmov 0   ;;  %vm1969_vm6 = vcmask 64512  }
 0x433   : > { %3179 = vmatpush3.msra.mxu0 %v1619_v0  ;;  %3190 = vmatpush3.msra.mxu1 %v1615_v21  ;;  %v1616_v4 = vld [vmem:[#allocation33] sm:$0xff]  ;;  %s5205_s5 = sld [smem:[#allocation64_spill]]  ;;  %v4962_v7 = vld [vmem:[%s1201_s22] sm:$0x3]  ;;  %s4414_s3 = smov 32   ;;  %v2136_v20 = vld [vmem:[#allocation18 + $0x18] sm:$0xff] }
 0x434   : > { %3180 = vmatprep.subr.mxu0 %v4412_v25  ;;  %3191 = vmatprep.subr.mxu1 %v4412_v25  ;;  %v1612_v5 = vld [vmem:[#allocation31] sm:$0xff]  ;;  %v2133_v28 = vld [vmem:[#allocation18] sm:$0xff]  ;;  %vm1791_vm7 = vcmask 523264   ;;  %v2237_v49 = vld [vmem:[#allocation30] sm:$0xf]  ;;  %vm2242_vm8 = vcmask 1043456  }
 0x435   : > { %3181 = vmatpush3.msra.mxu0 %v1618_v26  ;;  %3192 = vmatpush3.msra.mxu1 %v1614_v1  ;;  %v2135_v22 = vld [vmem:[#allocation18 + $0x10] sm:$0xff]  ;;  %v2134_v27 = vld [vmem:[#allocation18 + $0x8] sm:$0xff]  ;;  %v3044_v40 = vld [vmem:[#allocation19] ss:$0 sm:$0xff]  ;;  %vm2238_vm9 = vcmask 31744   ;;  %s4415_s25 = smov 64  }
 0x436   : > { %3182 = vmatprep.subr.mxu0 %v4412_v25  ;;  %3193 = vmatprep.subr.mxu1 %v4412_v25  ;;  %v3039_v31 = vld [vmem:[#allocation34] ss:$0 sm:$0xff]  ;;  %v5017_v50 = vld [vmem:[%s1205_s6] sm:$0x3]  ;;  %v3047_v55 = vld [vmem:[#allocation21] ss:$0 sm:$0xff] }
 0x437   : > { %3183 = vmatpush3.msra.mxu0 %v1617_v2  ;;  %3194 = vmatpush3.msra.mxu1 %v1613_v3  ;;  %v1968_v6 = vld [vmem:[%s5202_s18] sm:$0xff]  ;;  %v4416_v62 = vmov 0   ;;  %s4417_s11 = smov 96   ;;  %v2411_v21 = vld [vmem:[#allocation24 + $0x18] sm:$0xff]  ;;  %vm2616_vm10 = vcmask 254976   ;;  %s4418_s28 = smov 1  }
 0x438   : > { %3184 = vmatprep.subr.mxu0 %v4412_v25  ;;  %3195 = vmatprep.subr.mxu1 %v4412_v25  ;;  %v1783_v8 = vld [vmem:[%s5204_s7 + $0x38] sm:$0xff]  ;;  %v1782_v11 = vld [vmem:[%s5204_s7 + $0x30] sm:$0xff]  ;;  %v1781_v13 = vld [vmem:[%s5204_s7 + $0x28] sm:$0xff]  ;;  %vm1888_vm11 = vcmask 17408   ;;  %s1868_s16 = sld [smem:[#allocation6 + %s4599_s17]]  ;;  %vm1903_vm12 = vcmask 0  }
 0x439   : > { %3185 = vmatpush3.msra.mxu0 %v1616_v4  ;;  %3186 = vmatprep.mubr.msk.f32.mxu0 %vm4413_vm5, %v4412_v25  ;;  %v2046_v9 = vld [vmem:[%s5205_s5 + $0x18] sm:$0xff]  ;;  %v2045_v10 = vld [vmem:[%s5205_s5 + $0x10] sm:$0xff]  ;;  %v2044_v12 = vld [vmem:[%s5205_s5 + $0x8] sm:$0xff]  ;;  %p3480_p7 = scmp.eq.s32.totalorder %s4599_s17, 2 }
 0x43a   : > { %3196 = vmatpush3.msra.mxu1 %v1612_v5  ;;  %3197 = vmatprep.mubr.msk.f32.mxu1 %vm4413_vm5, %v4412_v25  ;;  %v2043_v14 = vld [vmem:[%s5205_s5] sm:$0xff]  ;;  %v1779_v16 = vld [vmem:[%s5204_s7 + $0x18] sm:$0xff]  ;;  %v1778_v17 = vld [vmem:[%s5204_s7 + $0x10] sm:$0xff] }
 0x43b   : > { %3187 = vmatmul.mubr.msk.f32.vlgmr.msra.gmra.mxu0 %vm1620_vm4, %v4346_v23  ;;  %3198 = vmatmul.mubr.msk.f32.vlgmr.msra.gmra.mxu1 %vm1620_vm4, %v4350_v24  ;;  %v1780_v15 = vld [vmem:[%s5204_s7 + $0x20] sm:$0xff]  ;;  %v1777_v18 = vld [vmem:[%s5204_s7 + $0x8] sm:$0xff]  ;;  %v2409_v4 = vld [vmem:[#allocation24 + $0x8] sm:$0xff] }
 0x43c   : > { %3219 = vmatprep.subr.mxu1 %v4412_v25  ;;  %3221 = vmatprep.mubr.msk.f32.mxu1 %vm4413_vm5, %v4412_v25  ;;  %v1776_v19 = vld [vmem:[%s5204_s7] sm:$0xff]  ;;  %v2334_v26 = vld [vmem:[#allocation22 + $0x18] sm:$0xff]  ;;  %v2332_v5 = vld [vmem:[#allocation22 + $0x8] sm:$0xff] }
 0x43d   : > { %3220 = vmatpush3.msra.mxu1 %v1968_v6  ;;  %2226 = vrot.lane.b32.xlu1 %v4350_v24, %s4414_s3  ;;  %v1867_v0 = vld [vmem:[%s1209_s2] sm:$0x3]  ;;  %v2408_v6 = vld [vmem:[#allocation24] sm:$0xff]  ;;  %s4419_s2 = smov 127  }
 0x43e   : > { %3224 = vmatprep.subr.mxu1 %v4412_v25  ;;  %3200 = vmatprep.subr.mxu0 %v4412_v25  ;;  %v2410_v1 = vld [vmem:[#allocation24 + $0x10] sm:$0xff]  ;;  %s1869_s18 = scvt.s32.f32 %s1868_s16 }
 0x43f   : > { %3222 = vmatmul.mubr.msk.f32.vlgmr.msra.gmra.mxu1 %vm1969_vm6, %v4962_v7  ;;  %3201 = vmatpush3.msra.mxu0 %v1783_v8  ;;  %v2333_v3 = vld [vmem:[#allocation22 + $0x10] sm:$0xff] }
 0x440   : > { %3225 = vmatpush3.msra.mxu1 %v2046_v9  ;;  %3232 = vmatprep.mubr.msk.f32.mxu1 %vm4413_vm5, %v4412_v25 }
 0x441   : > { %3226 = vmatprep.subr.mxu1 %v4412_v25  ;;  %3202 = vmatprep.subr.mxu0 %v4412_v25 }
 0x442   : > { %3227 = vmatpush3.msra.mxu1 %v2045_v10  ;;  %3203 = vmatpush3.msra.mxu0 %v1782_v11  ;;  %v2331_v10 = vld [vmem:[#allocation22] sm:$0xff] }
 0x443   : > { %3228 = vmatprep.subr.mxu1 %v4412_v25  ;;  %3204 = vmatprep.subr.mxu0 %v4412_v25 }
 0x444   : > { %3229 = vmatpush3.msra.mxu1 %v2044_v12  ;;  %3205 = vmatpush3.msra.mxu0 %v1781_v13 }
 0x445   : > { %3230 = vmatprep.subr.mxu1 %v4412_v25  ;;  %3206 = vmatprep.subr.mxu0 %v4412_v25 }
 0x446   : > { %3231 = vmatpush3.msra.mxu1 %v2043_v14  ;;  %3207 = vmatpush3.msra.mxu0 %v1780_v15 }
 0x447   : > { %3233 = vmatmul.mubr.msk.f32.vlgmr.msra.gmra.mxu1 %vm1620_vm4, %v4350_v24  ;;  %3208 = vmatprep.subr.mxu0 %v4412_v25 }
 0x448   : > { %3216 = vmatprep.mubr.msk.f32.mxu0 %vm4413_vm5, %v4412_v25  ;;  %3235 = vmatprep.subr.mxu1 %v4412_v25 }
 0x449   : > { %3243 = vmatprep.mubr.msk.f32.mxu1 %vm4413_vm5, %v4412_v25  ;;  %3209 = vmatpush3.msra.mxu0 %v1779_v16 }
 0x44a   : > { %3210 = vmatprep.subr.mxu0 %v4412_v25  ;;  %3236 = vmatpush3.msra.mxu1 %v2136_v20 }
 0x44b   : > { %3211 = vmatpush3.msra.mxu0 %v1778_v17  ;;  %3237 = vmatprep.subr.mxu1 %v4412_v25 }
 0x44c   : > { %3212 = vmatprep.subr.mxu0 %v4412_v25  ;;  %3238 = vmatpush3.msra.mxu1 %v2135_v22 }
 0x44d   : > { %3213 = vmatpush3.msra.mxu0 %v1777_v18  ;;  %3239 = vmatprep.subr.mxu1 %v4412_v25 }
 0x44e   : > { %3214 = vmatprep.subr.mxu0 %v4412_v25  ;;  %3240 = vmatpush3.msra.mxu1 %v2134_v27 }
 0x44f   : > { %3215 = vmatpush3.msra.mxu0 %v1776_v19  ;;  %3241 = vmatprep.subr.mxu1 %v4412_v25 }
 0x450   : > { %3251 = vmatprep.subr.mxu0 %v4412_v25  ;;  %3242 = vmatpush3.msra.mxu1 %v2133_v28 }
 0x451   : > { %3246 = vmatprep.subr.mxu1 %v4412_v25  ;;  %3620 = vset.pattern.permute.xlu1 %v4416_v62 }
 0x452   : > { %3621 = vset.pattern.permute.xlu0 %v4416_v62 }
 0x4af   : > { %v2227_v2 = vpop.permute.xlu1 %2226 }
 0x4fb   : > { %v1690_v29 = vpop.f32.mrf.mxu0  ;;  %v1763_v30 = vpop.f32.mrf.mxu1 }
 0x4fc   : > { %v1764_v32 = vadd.f32 %v1763_v30, %v1690_v29 }
 0x4fd   : > { %v3199_v33 = vpop.f32.mrf.mxu1  ;;  %v3188_v34 = vpop.f32.mrf.mxu0 }
 0x4fe   : > { %v1774_v35 = vadd.f32 %v3039_v31, %v1764_v32  ;;  %v2501_v31 = vld [vmem:[#allocation25 + $0x18] sm:$0xff]  ;;  %v2500_v32 = vld [vmem:[#allocation25 + $0x10] sm:$0xff]  ;;  %v2499_v33 = vld [vmem:[#allocation25 + $0x8] sm:$0xff] }
 0x4ff   : > { %v2039_v36 = vpop.f32.mrf.mxu1  ;;  %v2498_v34 = vld [vmem:[#allocation25] sm:$0xff] }
 0x500   : > { %v1775_v37 = vmax.f32 %v1774_v35, 0.0  ;;  %v3052_v35 = vld [vmem:[#allocation27] ss:$0 sm:$0xff] }
 0x501   : > { %v3223_v38 = vpop.f32.mrf.mxu1 }
 0x502   : > { %3217 = vmatmul.mubr.msk.f32.vlgmr.msra.gmra.mxu0 %vm1791_vm7, %v1775_v37 }
 0x503   : > { %3259 = vmatprep.mubr.msk.f32.mxu0 %vm4413_vm5, %v4412_v25  ;;  %3252 = vmatpush3.msra.mxu0 %v2334_v26 }
 0x504   : > { %3253 = vmatprep.subr.mxu0 %v4412_v25 }
 0x505   : > { %3254 = vmatpush3.msra.mxu0 %v2333_v3 }
 0x506   : > { %3255 = vmatprep.subr.mxu0 %v4412_v25 }
 0x507   : > { %v2113_v39 = vpop.f32.mrf.mxu1  ;;  %3256 = vmatpush3.msra.mxu0 %v2332_v5 }
 0x508   : > { %v2117_v41 = vadd.f32 %v2113_v39, %v2039_v36  ;;  %3257 = vmatprep.subr.mxu0 %v4412_v25 }
 0x509   : > { %v3234_v42 = vpop.f32.mrf.mxu1  ;;  %3258 = vmatpush3.msra.mxu0 %v2331_v10 }
 0x50a   : > { %v2125_v43 = vadd.f32 %v3044_v40, %v2117_v41  ;;  %3273 = vmatprep.subr.mxu0 %v4412_v25 }
 0x50c   : > { %v3045_v44 = vmul.f32 -1.442695, %v2125_v43 }
 0x50e   : > { %3622 = vpow2.f32 %v3045_v44  ;;  %v3055_v44 = vld [vmem:[#allocation28] ss:$0 sm:$0xff] }
 0x51b   : > { %v3623_v45 = vpop.eup %3622 }
 0x51c   : > { %v2129_v46 = vadd.f32 1.0, %v3623_v45 }
 0x51e   : > { %3624 = vrcp.f32 %v2129_v46 }
 0x52b   : > { %v5007_v47 = vpop.eup %3624 }
 0x52c   : > { %v2132_v48 = vmul.f32 %v4350_v24, %v5007_v47  ;;  %v2230_v8 = vsub.f32 1.0, %v5007_v47  ;;  %v2229_v11 = vmul.f32 %v5007_v47, %v2227_v2 }
 0x52e   : > { %3244 = vmatmul.mubr.msk.f32.vlgmr.msra.gmra.mxu1 %vm1620_vm4, %v2132_v48  ;;  %v1927_v48 = vadd.f32 1e-08, %v4962_v7 }
 0x52f   : > { %3247 = vmatpush3.msk.msra.mxu1 %vm2242_vm8, %v2237_v49  ;;  %3248 = vmatprep.mubr.msk.f32.mxu1 %vm4413_vm5, %v4412_v25 }
 0x530   : > { %3262 = vmatprep.subr.mxu1 %v4412_v25 }
 0x532   : > { %3249 = vmatmul.mubr.msk.f32.vlgmr.msra.gmra.mxu1 %vm2238_vm9, %v5017_v50 }
 0x533   : > { %3270 = vmatprep.mubr.msk.f32.mxu1 %vm4413_vm5, %v4412_v25  ;;  %3263 = vmatpush3.msra.mxu1 %v2411_v21 }
 0x534   : > { %3264 = vmatprep.subr.mxu1 %v4412_v25 }
 0x535   : > { %3265 = vmatpush3.msra.mxu1 %v2410_v1 }
 0x536   : > { %3266 = vmatprep.subr.mxu1 %v4412_v25 }
 0x537   : > { %3267 = vmatpush3.msra.mxu1 %v2409_v4 }
 0x538   : > { %3268 = vmatprep.subr.mxu1 %v4412_v25 }
 0x539   : > { %3269 = vmatpush3.msra.mxu1 %v2408_v6 }
 0x53a   : > { %3271 = vmatmul.mubr.msk.f32.vlgmr.msra.gmra.mxu1 %vm1620_vm4, %v4346_v23 }
 0x5c2   : > { %v5023_v51 = vpop.f32.mrf.mxu0 }
 0x5c4   : > { %v3218_v52 = vpop.f32.mrf.mxu0 }
 0x5ee   : > { %v2206_v53 = vpop.f32.mrf.mxu1 }
 0x5ef   : > { %2211 = vrot.lane.b32.xlu0 %v2206_v53, %s4415_s25 }
 0x5f0   : > { %v3245_v54 = vpop.f32.mrf.mxu1 }
 0x5f2   : > { %v2312_v56 = vpop.f32.mrf.mxu1 }
 0x5f3   : > { %2221 = vrot.lane.b32.xlu0 %v3047_v55, %s4415_s25  ;;  %v2316_v16 = vsub.f32 1.0, %v2312_v56 }
 0x5f4   : > { %v3250_v57 = vpop.f32.mrf.mxu1 }
 0x5f5   : > { %v2317_v17 = vmul.f32 %v4350_v24, %v2316_v16 }
 0x5f7   : > { %2319 = vrot.lane.b32.xlu0 %v2312_v56, %s4414_s3 }
 0x5fa   : > { %v2478_v29 = vpop.f32.mrf.mxu1 }
 0x5fc   : > { %v3272_v30 = vpop.f32.mrf.mxu1 }
 0x661   : > { %v2212_v58 = vpop.permute.xlu0 %2211 }
 0x662   : > { %v2214_v59 = vadd.f32 %v2212_v58, %v2039_v36 }
 0x665   : > { %v2222_v60 = vpop.permute.xlu0 %2221 }
 0x666   : > { %v2224_v61 = vadd.f32 %v2222_v60, %v2214_v59 }
 0x668   : > { %3626 = vtanh.f32 %v2224_v61 }
 0x669   : > { %v2320_v13 = vpop.permute.xlu0 %2319 }
 0x675   : > { %v3627_v63 = vpop.eup %3626 }
 0x676   : > { %2232 = vrot.lane.b32.xlu1 %v3627_v63, %s4417_s11 }
 0x67a   : > { %1872 = vperm.xlu1 %3620, %v1867_v0  }
 0x6e8   : > { %v2233_v9 = vpop.permute.xlu1 %2232 }
 0x6e9   : > { %v2235_v12 = vmul.f32 %v2233_v9, %v2230_v8 }
 0x6eb   : > { %v2236_v14 = vadd.f32 %v2235_v12, %v2229_v11 }
 0x6ed   : > { %v2322_v15 = vmul.f32 %v2320_v13, %v2236_v14 }
 0x6ef   : > { %2324 = vrot.lane.b32.xlu0 %v2322_v15, %s4417_s11 }
 0x6f3   : > { %2586 = vrot.lane.b32.xlu0 %v3055_v44, %s4415_s25  ;;  %v1881_v44 = vld [vmem:[#allocation37] sm:$0x1] }
 0x6f5   : > { %v5045_v20 = vpop.permute.xlu1 %1872 }
 0x6f6   : > { %v1875_v58 = vmul.f32 %v5045_v20, %v5017_v50 }
 0x761   : > { %v2325_v18 = vpop.permute.xlu0 %2324 }
 0x762   : > { %v2327_v19 = vadd.f32 %v2325_v18, %v2317_v17 }
 0x764   : > { %v2328_v22 = vsub.f32 %v2327_v19, %v4350_v24 }
 0x765   : > { %v2587_v52 = vpop.permute.xlu0 %2586 }
 0x766   : > { %v2329_v27 = vmul.f32 %v2328_v22, %v5045_v20 }
 0x768   : > { %v2330_v28 = vadd.f32 %v4350_v24, %v2329_v27 }
 0x76a   : > { %3260 = vmatmul.mubr.msk.f32.vlgmr.msra.gmra.mxu0 %vm1620_vm4, %v2330_v28  ;;  %2617 = vst.msk [vmem:[#allocation2] sm:$0x3] %vm2616_vm10, %v2330_v28 }
 0x76b   : > { %3281 = vmatprep.mubr.msk.f32.mxu0 %vm4413_vm5, %v4412_v25  ;;  %3274 = vmatpush3.msra.mxu0 %v2501_v31 }
 0x76c   : > { %3275 = vmatprep.subr.mxu0 %v4412_v25 }
 0x76d   : > { %3276 = vmatpush3.msra.mxu0 %v2500_v32 }
 0x76e   : > { %3277 = vmatprep.subr.mxu0 %v4412_v25 }
 0x76f   : > { %3278 = vmatpush3.msra.mxu0 %v2499_v33 }
 0x770   : > { %3279 = vmatprep.subr.mxu0 %v4412_v25  ;;  %v3040_v25 = vld [vmem:[#allocation36] ss:$0 sm:$0xff] }
 0x771   : > { %3280 = vmatpush3.msra.mxu0 %v2498_v34  ;;  %v1862_v47 = vadd.f32 %v3040_v25, %v5023_v51 }
 0x82a   : > { %v2404_v24 = vpop.f32.mrf.mxu0 }
 0x82b   : > { %v2482_v36 = vadd.f32 %v2478_v29, %v2404_v24 }
 0x82c   : > { %v3261_v37 = vpop.f32.mrf.mxu0 }
 0x82d   : > { %v2490_v38 = vadd.f32 %v3052_v35, %v2482_v36 }
 0x82f   : > { %v3053_v39 = vmul.f32 -1.442695, %v2490_v38 }
 0x831   : > { %3628 = vpow2.f32 %v3053_v39 }
 0x83e   : > { %v3629_v40 = vpop.eup %3628 }
 0x83f   : > { %v2494_v41 = vadd.f32 1.0, %v3629_v40 }
 0x841   : > { %3630 = vrcp.f32 %v2494_v41 }
 0x842   : > { %3632 = vrcp.f32 %v1927_v48 }
 0x84e   : > { %v3631_v42 = vpop.eup %3630 }
 0x84f   : > { %v2497_v43 = vmul.f32 %v4346_v23, %v3631_v42  ;;  %v3633_v57 = vpop.eup %3632 }
 0x851   : > { %3282 = vmatmul.mubr.msk.f32.vlgmr.msra.gmra.mxu0 %vm1620_vm4, %v2497_v43  ;;  %v1900_v43 = vstv %s1869_s18 }
 0x911   : > { %v2571_v45 = vpop.f32.mrf.mxu0 }
 0x912   : > { %2576 = vrot.lane.b32.xlu1 %v2571_v45, %s4415_s25 }
 0x913   : > { %v3283_v46 = vpop.f32.mrf.mxu0 }
 0x916   : > { %1877 = vrot.lane.b32.xlu1 %v1862_v47, %s4418_s28 }
 0x984   : > { %v2577_v49 = vpop.permute.xlu1 %2576 }
 0x985   : > { %v2579_v53 = vadd.f32 %v2577_v49, %v2404_v24 }
 0x987   : > { %v2589_v54 = vadd.f32 %v2587_v52, %v2579_v53 }
 0x988   : > { %v1878_v55 = vpop.permute.xlu1 %1877 }
 0x989   : > { %3634 = vtanh.f32 %v2589_v54  ;;  %v1880_v56 = vsub.f32 %v4962_v7, %v1878_v55 }
 0x98b   : > { %v1882_v59 = vmul.f32 %v1880_v56, %v1880_v56  ;;  %v1906_v60 = vand.u32 2147483647, %v1880_v56 }
 0x98d   : > { %v1929_v51 = vmul.f32 %v3633_v57, %v1906_v60  ;;  %v1883_v61 = vmul.f32 %v1882_v59, %v1875_v58  ;;  %v1907_v0 = vmul.f32 %v1906_v60, %v1875_v58 }
 0x98f   : > { %1885 = vrot.lane.b32.xlu1 %v1883_v61, %s4419_s2  ;;  %v1930_v62 = vmul.f32 %v1929_v51, %v1875_v58 }
 0x993   : > { %1932 = vrot.lane.b32.xlu1 %v1930_v62, %s4419_s2 }
 0x996   : > { %v5066_v63 = vpop.eup %3634 }
 0x997   : > { %2592 = vrot.lane.b32.xlu0 %v5066_v63, %s4415_s25 }
 0x99b   : > { %1909 = vrot.lane.b32.xlu0 %v1907_v0, %s4419_s2 }
 0x99f   : > { %1951 = vrot.lane.b32.xlu0 %v1875_v58, %s4419_s2 }
 0xa01   : > { %v1886_v7 = vpop.permute.xlu1 %1885 }
 0xa02   : > { %v1889_v21 = vsel %vm1888_vm11, %v1886_v7, 0.0 }
 0xa03   : > { %1890 = vadd.xlane.f32.xlu0 %v1889_v21 }
 0xa05   : > { %v1933_v50 = vpop.permute.xlu1 %1932 }
 0xa06   : > { %v1935_v26 = vsel %vm1888_vm11, %v1933_v50, 0.0 }
 0xa07   : > { %1936 = vadd.xlane.f32.xlu0 %v1935_v26 }
 0xa09   : > { %v2593_v1 = vpop.permute.xlu0 %2592 }
 0xa0a   : > { %v2595_v2 = vsub.f32 %v4346_v23, %v2593_v1 }
 0xa0c   : > { %2597 = vrot.lane.b32.xlu1 %v2595_v2, %s4414_s3 }
 0xa0d   : > { %v1910_v3 = vpop.permute.xlu0 %1909 }
 0xa0e   : > { %v1912_v6 = vsel %vm1888_vm11, %v1910_v3, 0.0 }
 0xa11   : > { %v1952_v4 = vpop.permute.xlu0 %1951 }
 0xa12   : > { %v1954_v5 = vsel %vm1888_vm11, %v1952_v4, 0.0 }
 0xa13   : > { %1955 = vadd.xlane.f32.xlu0 %v1954_v5 }
 0xa29   : > { %2606 = vrot.lane.b32.xlu0 %v4346_v23, %s4415_s25 }
 0xa30   : > { %1913 = vadd.xlane.f32.xlu1 %v1912_v6 }
 0xa7e   : > { %v2598_v8 = vpop.permute.xlu1 %2597 }
 0xa7f   : > { %v2600_v9 = vmul.f32 %v3631_v42, %v2598_v8 }
 0xa81   : > { %2602 = vrot.lane.b32.xlu1 %v2600_v9, %s4414_s3  ;;  %s4420_s3 = smov [#allocation37]  }
 0xa82   : > { %s2626_s22 = sshll.u32 %s4420_s3, 4  ;;  %s2627_s22 = int_to_ptr.vmem [resolvable:$true] %s2626_s22 }
 0xa83   : > { %s4154_s6 = scalar_lea.vmem %s2627_s22, 16  ;;  %s4160_s11 = scalar_lea.vmem %s2627_s22, 32 }
 0xa84   : > { %p4155_p0 = scmp.ne.s32.totalorder %s2627_s22, %s4154_s6  ;;  %p4161_p8 = scmp.lt.s32.totalorder %s2627_s22, %s2627_s22 }
 0xa85   : > { %p4162_p13 = scmp.lt.s32.totalorder %s4160_s11, %s4154_s6 }
 0xa86   : > { %p4156_p6 = pnand %p4155_p0, %p3480_p7 }
 0xa87   : > { %p4163_p3 = por %p4162_p13, %p4161_p8 }
 0xa88   : > { %p4157_p12 = pneg %p4156_p6 }
 0xa8a   : > { %p4164_p9 = pnand %p4163_p3, %p4157_p12 }
 0xa8c   : > { %v1891_v10 = vpop.xlane.xlu0 %1890 }
 0xa8d   : > { %v1892_v11 = vrot.slane %v1891_v10, 4 }
 0xa8f   : > { %v1893_v12 = vadd.f32 %v1892_v11, %v1891_v10 }
 0xa90   : > { %v1937_v17 = vpop.xlane.xlu0 %1936 }
 0xa91   : > { %v1894_v13 = vrot.slane %v1893_v12, 2  ;;  %v1938_v19 = vrot.slane %v1937_v17, 4 }
 0xa93   : > { %v1895_v14 = vadd.f32 %v1894_v13, %v1893_v12  ;;  %v1939_v27 = vadd.f32 %v1938_v19, %v1937_v17 }
 0xa95   : > { %v1896_v15 = vrot.slane %v1895_v14, 1  ;;  %v1940_v29 = vrot.slane %v1939_v27, 2 }
 0xa97   : > { %v1897_v16 = vadd.f32 %v1896_v15, %v1895_v14  ;;  %v1941_v34 = vadd.f32 %v1940_v29, %v1939_v27 }
 0xa99   : > { %3284 = vpush %v1897_v16  ;;  %v1942_v37 = vrot.slane %v1941_v34, 1 }
 0xa9b   : > { %v1943_v41 = vadd.f32 %v1942_v37, %v1941_v34 }
 0xa9c   : > { %v1956_v18 = vpop.xlane.xlu0 %1955 }
 0xa9d   : > { %v1957_v22 = vrot.slane %v1956_v18, 4 }
 0xa9f   : > { %v1958_v28 = vadd.f32 %v1957_v22, %v1956_v18 }
 0xaa1   : > { %v1959_v31 = vrot.slane %v1958_v28, 2 }
 0xaa3   : > { %v1960_v35 = vadd.f32 %v1959_v31, %v1958_v28 }
 0xaa5   : > { %v1961_v39 = vrot.slane %v1960_v35, 1 }
 0xaa7   : > { %v1962_v42 = vadd.f32 %v1961_v39, %v1960_v35 }
 0xab9   : > { %v1914_v30 = vpop.xlane.xlu1 %1913 }
 0xaba   : > { %v1915_v32 = vrot.slane %v1914_v30, 4 }
 0xabc   : > { %v1916_v33 = vadd.f32 %v1915_v32, %v1914_v30 }
 0xabe   : > { %v1917_v24 = vrot.slane %v1916_v33, 2 }
 0xac0   : > { %v1918_v36 = vadd.f32 %v1917_v24, %v1916_v33 }
 0xac2   : > { %v1919_v38 = vrot.slane %v1918_v36, 1 }
 0xac4   : > { %v1920_v40 = vadd.f32 %v1919_v38, %v1918_v36 }
 0xac6   : > { %3286 = vpush %v1920_v40 }
 0xac7   : > { %3288 = vpush %v1943_v41 }
 0xac8   : > { %3290 = vpush %v1962_v42 }
 0xaca   : > { %s3285_s26 = spop %3284 }
 0xacb   : > { %v1899_v25 = vstv %s3285_s26 }
 0xacc   : > { %v1901_v45 = vmul.f32 %v1900_v43, %v1899_v25 }
 0xace   : > { %v1902_v46 = vadd.f32 %v1901_v45, %v1881_v44 }
 0xad0   : > { %1904 = vst.msk [vmem:[#allocation37] sm:$0x1] %vm1903_vm12, %v1902_v46 }
 0xad1   : > { %4167 = shalt.err (!%p4164_p9)
}
 0xad2   : > { %3369 = dma.vmem_to_hbm [thread:$0]  (%p3480_p7), %s2627_s22, 16, %s4572_s1, [#allocation9]   ;;  %v2607_v48 = vpop.permute.xlu0 %2606  ;;  %v1905_v54 = vld [vmem:[#allocation38] sm:$0x1]  ;;  %v1926_v57 = vld [vmem:[#allocation40] sm:$0x1] }
 0xad3   : > { %s4421_s16 = smov [#allocation38]   ;;  %s4422_s3 = smov [#allocation40]   ;;  %v1949_v60 = vld [vmem:[#allocation41] sm:$0x1] }
 0xad4   : > { %s2637_s18 = sshll.u32 %s4421_s16, 4  ;;  %s2648_s6 = sshll.u32 %s4422_s3, 4  ;;  %s2638_s18 = int_to_ptr.vmem [resolvable:$true] %s2637_s18  ;;  %s2649_s6 = int_to_ptr.vmem [resolvable:$true] %s2648_s6 }
 0xad5   : > { %s4423_s22 = smov [#allocation41]   ;;  %p4185_p1 = scmp.lt.s32.totalorder %s2638_s18, %s2638_s18 }
 0xad6   : > { %s2659_s11 = sshll.u32 %s4423_s22, 4  ;;  %s5087_s11 = int_to_ptr.vmem [resolvable:$true] %s2659_s11 }
 0xaf3   : > { %v2603_v47 = vpop.permute.xlu1 %2602 }
 0xaf4   : > { %v2605_v49 = vadd.f32 %v5066_v63, %v2603_v47 }
 0xaf6   : > { %v2609_v52 = vsub.f32 %v2605_v49, %v2607_v48 }
 0xaf7   : > { %s3287_s28 = spop %3286 }
 0xaf8   : > { %v2610_v53 = vmul.f32 %v2609_v52, %v5045_v20  ;;  %v1922_v55 = vstv %s3287_s28  ;;  %s3289_s2 = spop %3288  ;;  %s4178_s28 = scalar_lea.vmem %s2638_s18, 16 }
 0xaf9   : > { %v1923_v56 = vmul.f32 %v1922_v55, %v1900_v43  ;;  %v1945_v58 = vstv %s3289_s2  ;;  %s3291_s26 = spop %3290  ;;  %p4179_p11 = scmp.ne.s32.totalorder %s2638_s18, %s4178_s28 }
 0xafa   : > { %v1946_v59 = vmul.f32 %v1945_v58, %v1900_v43  ;;  %v1964_v51 = vstv %s3291_s26  ;;  %2612 = vrot.lane.b32.xlu1 %v2610_v53, %s4415_s25  ;;  %s4184_s2 = scalar_lea.vmem %s2638_s18, 32 }
 0xafb   : > { %v1924_v20 = vadd.f32 %v1923_v56, %v1905_v54  ;;  %v1965_v61 = vmul.f32 %v1964_v51, %v1900_v43  ;;  %p4180_p2 = pnand %p4179_p11, %p3480_p7  ;;  %p4186_p4 = scmp.lt.s32.totalorder %s4184_s2, %s4178_s28 }
 0xafc   : > { %v1947_v62 = vadd.f32 %v1946_v59, %v1926_v57 }
 0xafd   : > { %v1966_v63 = vadd.f32 %v1965_v61, %v1949_v60  ;;  %1925 = vst.msk [vmem:[#allocation38] sm:$0x1] %vm1903_vm12, %v1924_v20  ;;  %p4181_p10 = pneg %p4180_p2  ;;  %p4187_p5 = por %p4186_p4, %p4185_p1 }
 0xaff   : > { %p4188_p0 = pnand %p4187_p5, %p4181_p10 }
 0xb01   : > { %4191 = shalt.err (!%p4188_p0)
}
 0xb02   : > { %3371 = dma.vmem_to_hbm [thread:$0]  (%p3480_p7), %s2638_s18, 16, %s4577_s27, [#allocation39]   ;;  %1948 = vst.msk [vmem:[#allocation40] sm:$0x1] %vm1903_vm12, %v1947_v62  ;;  %1967 = vst.msk [vmem:[#allocation41] sm:$0x1] %vm1903_vm12, %v1966_v63 }
 0xb03   : > { %s4202_s25 = scalar_lea.vmem %s2649_s6, 16  ;;  %s4208_s16 = scalar_lea.vmem %s2649_s6, 32 }
 0xb04   : > { %p4203_p6 = scmp.ne.s32.totalorder %s2649_s6, %s4202_s25  ;;  %p4209_p13 = scmp.lt.s32.totalorder %s2649_s6, %s2649_s6 }
 0xb05   : > { %p4210_p3 = scmp.lt.s32.totalorder %s4208_s16, %s4202_s25 }
 0xb06   : > { %p4204_p12 = pnand %p4203_p6, %p3480_p7 }
 0xb07   : > { %p4211_p9 = por %p4210_p3, %p4209_p13 }
 0xb08   : > { %p4205_p8 = pneg %p4204_p12 }
 0xb0a   : > { %p4212_p11 = pnand %p4211_p9, %p4205_p8 }
 0xb0c   : > { %4215 = shalt.err (!%p4212_p11)
}
 0xb0d   : > { %3373 = dma.vmem_to_hbm [thread:$0]  (%p3480_p7), %s2649_s6, 16, %s4583_s15, [#allocation39]  }
 0xb0e   : > { %s4226_s18 = scalar_lea.vmem %s5087_s11, 16  ;;  %s4232_s26 = scalar_lea.vmem %s5087_s11, 32 }
 0xb0f   : > { %p4227_p2 = scmp.ne.s32.totalorder %s5087_s11, %s4226_s18  ;;  %p4233_p4 = scmp.lt.s32.totalorder %s5087_s11, %s5087_s11 }
 0xb10   : > { %p4234_p5 = scmp.lt.s32.totalorder %s4232_s26, %s4226_s18 }
 0xb11   : > { %p4228_p10 = pnand %p4227_p2, %p3480_p7 }
 0xb12   : > { %p4235_p0 = por %p4234_p5, %p4233_p4 }
 0xb13   : > { %p4229_p1 = pneg %p4228_p10 }
 0xb15   : > { %p4236_p6 = pnand %p4235_p0, %p4229_p1 }
 0xb17   : > { %4239 = shalt.err (!%p4236_p6)
}
 0xb18   : > { %3375 = dma.vmem_to_hbm [thread:$0]  (%p3480_p7), %s5087_s11, 16, %s4588_s13, [#allocation42]  }
 0xb6c   : > { %v2613_v0 = vpop.permute.xlu1 %2612 }
 0xb6d   : > { %v2615_v7 = vadd.f32 %v4346_v23, %v2613_v0 }
 0xb6f   : > { %2618 = vst.msk [vmem:[#allocation3] sm:$0x3] %vm2616_vm10, %v2615_v7 }
 0xb70   : > { %4317 = dma.done.wait (%p3480_p7), [#allocation9], 16  }
 0xb71   : > { %4319 = vsyncadd (%p3480_p7), [#allocation9], 4294967280 }
 0xb72   : > { %4321 = dma.done.wait (%p3480_p7), [#allocation39], 32  }
 0xb73   : > { %4323 = vsyncadd (%p3480_p7), [#allocation39], 4294967264 }
 0xb74   : > { %4325 = dma.done.wait (%p3480_p7), [#allocation42], 16  }
 0xb75   : > { %4327 = vsyncadd (%p3480_p7), [#allocation42], 4294967280 }
 0xb76 PF: > { %s99_s0 = sadd.s32 1, %s4330_s0  }
 0xb77   : > { %p96_p12 = scmp.ge.s32.totalorder %s99_s0, 5  }
 0xb79   :  { %98 = sbr.rel (!%p96_p12) target bundleno = 87 (0x57), region = 316 }
 0xb7e   :  { %2684 = vsyncpa [#allocation8], 1 }
 0xb7f   :  { %2686 = vsyncpa [#allocation8 + $0x1], 1 }
 0xb80   :  { %2687 = vsyncpa [#allocation11], 1 }
 0xb81   :  { %2688 = vsyncpa [#allocation14], 1 }
 0xb82   :  { %2689 = vsyncpa [#allocation17], 1 }
 0xb83   :  { %2690 = vsyncpa [#allocation20], 1 }
 0xb84   :  { %2691 = vsyncpa [#allocation23], 1 }
 0xb85   :  { %2692 = vsyncpa [#allocation26], 1 }
 0xb86   :  { %2693 = vsyncpa [#allocation29], 1 }
 0xb87   :  { %2694 = vsyncpa [#allocation32], 1 }
 0xb88   :  { %2695 = vsyncpa [#allocation35], 1 }
 0xb89   :  { %2696 = vsyncpa [#allocation9], 1 }
 0xb8a   :  { %2698 = vsyncpa [#allocation9 + $0x1], 1 }
 0xb8b   :  { %2699 = vsyncpa [#allocation39], 1 }
 0xb8c   :  { %2700 = vsyncpa [#allocation42], 1 }

</bundles_post_ra>
